<compile_context>
chip_gen: v7x
topology: tpu7x:2x2x1
jax: 0.10.0
libtpu: 0.0.40
codegen_flags: <defaults>
</compile_context>

<pallas_src>
import functools

import jax
import jax.numpy as jnp
from jax import lax
from jax.experimental import pallas as pl
from jax.experimental.pallas import tpu as pltpu


def _round_up(v, m):
    return ((v + m - 1) // m) * m


def _birnn_kernel(x_ref,
                  wih_fw_ref, whh_fw_ref, b_fw_ref,
                  wih_bw_ref, whh_bw_ref, b_bw_ref,
                  wfc_fw_ref, wfc_bw_ref, bfc_ref,
                  out_ref,
                  xp_fw, xp_bw,
                  *, fn):
    T, Bp, Hp = xp_fw.shape            # scratch: (T, Bp, Hp) f32 per direction

    # ---- Phase 1: hoisted input projection --------------------------------
    # One big (T*Bp, Ip) @ (Ip, Hp) bf16 matmul per direction instead of T
    # tiny per-step matmuls.  The fused RNNCell bias (b_ih + b_hh) is added
    # here once (single broadcast), so the serial loop below is only
    # h @ W_hh + precomputed[t].
    x2d = x_ref[...]                                             # (T*Bp, Ip) bf16
    proj_fw = jnp.dot(x2d, wih_fw_ref[...], preferred_element_type=jnp.float32)
    proj_bw = jnp.dot(x2d, wih_bw_ref[...], preferred_element_type=jnp.float32)
    xp_fw[...] = (proj_fw + b_fw_ref[...]).reshape(T, Bp, Hp)
    xp_bw[...] = (proj_bw + b_bw_ref[...]).reshape(T, Bp, Hp)

    # ---- Phase 2: serial recurrence (both directions) ----------------------
    whh_fw = whh_fw_ref[...]           # bf16, loaded once (hoisted)
    whh_bw = whh_bw_ref[...]

    def step(t, carry):
        hf, hb = carry                 # f32 hidden states stay in vregs
        hf = jnp.tanh(xp_fw[t]
                      + jnp.dot(hf.astype(jnp.bfloat16), whh_fw,
                                preferred_element_type=jnp.float32))
        hb = jnp.tanh(xp_bw[T - 1 - t]
                      + jnp.dot(hb.astype(jnp.bfloat16), whh_bw,
                                preferred_element_type=jnp.float32))
        return hf, hb

    h0 = jnp.zeros((Bp, Hp), jnp.float32)
    hf, hb = lax.fori_loop(0, T, step, (h0, h0), unroll=True)

    # ---- Phase 3: final Linear on concat(h_fw, h_bw), split into halves ---
    # fc(concat(h_fw, h_bw)) == h_fw @ Wfc[:, :H].T + h_bw @ Wfc[:, H:].T + b
    out = (jnp.dot(hf.astype(jnp.bfloat16), wfc_fw_ref[...],
                   preferred_element_type=jnp.float32)
           + jnp.dot(hb.astype(jnp.bfloat16), wfc_bw_ref[...],
                     preferred_element_type=jnp.float32)
           + bfc_ref[...])
    if fn == "relu":
        out = jnp.maximum(out, 0.0)
    elif fn == "tanh":
        out = jnp.tanh(out)
    # softmax is applied in the wrapper after slicing off the O padding
    # (softmax over padded lanes would distort the normalization).
    out_ref[...] = out


def birnn2_forward(inputs, params, fn=None):
    """Pallas implementation of BiRNN2.forward. inputs: (B, T, I) float32."""
    B, T, I = inputs.shape
    H = params["wih_fw"].shape[1]
    O = params["bfc"].shape[1]

    # Pad toward hardware tiles: batch -> sublane multiple (8),
    # I / H / O -> lane multiples (128).  Zero padding is exact: padded
    # hidden units / output lanes stay identically zero and are sliced off.
    Bp = _round_up(B, 8)
    Ip = _round_up(I, 128)
    Hp = _round_up(H, 128)
    Op = _round_up(O, 128)

    def pad2(w, r, c):
        return jnp.pad(w, ((0, r - w.shape[0]), (0, c - w.shape[1])))

    # (B, T, I) -> time-major, padded, flattened to (T*Bp, Ip), bf16 MXU
    # operand; passed ONCE (both directions use the same VMEM copy).
    x = jnp.transpose(inputs, (1, 0, 2))
    x = jnp.pad(x, ((0, 0), (0, Bp - B), (0, Ip - I)))
    x = x.reshape(T * Bp, Ip).astype(jnp.bfloat16)

    bf16 = jnp.bfloat16
    args = (
        x,
        pad2(params["wih_fw"], Ip, Hp).astype(bf16),
        pad2(params["whh_fw"], Hp, Hp).astype(bf16),
        pad2(params["b_fw"], 1, Hp),                    # f32
        pad2(params["wih_bw"], Ip, Hp).astype(bf16),
        pad2(params["whh_bw"], Hp, Hp).astype(bf16),
        pad2(params["b_bw"], 1, Hp),                    # f32
        pad2(params["wfc_fw"], Hp, Op).astype(bf16),
        pad2(params["wfc_bw"], Hp, Op).astype(bf16),
        pad2(params["bfc"], 1, Op),                     # f32
    )

    vmem_spec = pl.BlockSpec(memory_space=pltpu.MemorySpace.VMEM)
    out = pl.pallas_call(
        functools.partial(_birnn_kernel, fn=fn),
        out_shape=jax.ShapeDtypeStruct((Bp, Op), jnp.float32),
        in_specs=[vmem_spec] * len(args),
        out_specs=vmem_spec,
        scratch_shapes=[pltpu.VMEM((T, Bp, Hp), jnp.float32),   # x @ Wih_fw + b
                        pltpu.VMEM((T, Bp, Hp), jnp.float32)],  # x @ Wih_bw + b
        compiler_params=pltpu.CompilerParams(
            vmem_limit_bytes=16 * 1024 * 1024),  # explicit, ample headroom on v5e/v6e/v7x
    )(*args)

    out = out[:B, :O]
    if fn == "softmax":
        out = jax.nn.softmax(out, axis=-1)
    return out


def birnn2_reference(inputs, params, fn=None):
    """Pure-JAX reference mirroring the PyTorch forward pass, using the same
    bf16-operand / f32-accumulate matmul numerics as the kernel."""
    B, T, _ = inputs.shape
    H = params["wih_fw"].shape[1]

    def mdot(a, b):
        return jnp.dot(a.astype(jnp.bfloat16), b.astype(jnp.bfloat16),
                       preferred_element_type=jnp.float32)

    h_fw = jnp.zeros((B, H), jnp.float32)
    for t in range(T):
        h_fw = jnp.tanh((mdot(inputs[:, t], params["wih_fw"]) + params["b_fw"])
                        + mdot(h_fw, params["whh_fw"]))
    h_bw = jnp.zeros((B, H), jnp.float32)
    for t in range(T - 1, -1, -1):
        h_bw = jnp.tanh((mdot(inputs[:, t], params["wih_bw"]) + params["b_bw"])
                        + mdot(h_bw, params["whh_bw"]))
    out = (mdot(h_fw, params["wfc_fw"]) + mdot(h_bw, params["wfc_bw"])
           + params["bfc"])
    if fn == "relu":
        out = jnp.maximum(out, 0.0)
    elif fn == "tanh":
        out = jnp.tanh(out)
    elif fn == "softmax":
        out = jax.nn.softmax(out, axis=-1)
    return out


def init_params(key, input_size, hidden_size, output_size):
    """Deterministic init matching PyTorch's uniform(-1/sqrt(fan), 1/sqrt(fan))."""
    keys = jax.random.split(key, 11)
    s_rnn = 1.0 / jnp.sqrt(hidden_size)
    s_fc = 1.0 / jnp.sqrt(2 * hidden_size)
    u = lambda k, shape, s: jax.random.uniform(k, shape, jnp.float32, -s, s)
    # Weights stored pre-transposed (x @ W); RNNCell biases fused (b_ih + b_hh).
    return {
        "wih_fw": u(keys[0], (input_size, hidden_size), s_rnn),
        "whh_fw": u(keys[1], (hidden_size, hidden_size), s_rnn),
        "b_fw":   u(keys[2], (1, hidden_size), s_rnn) + u(keys[3], (1, hidden_size), s_rnn),
        "wih_bw": u(keys[4], (input_size, hidden_size), s_rnn),
        "whh_bw": u(keys[5], (hidden_size, hidden_size), s_rnn),
        "b_bw":   u(keys[6], (1, hidden_size), s_rnn) + u(keys[7], (1, hidden_size), s_rnn),
        "wfc_fw": u(keys[8], (hidden_size, output_size), s_fc),
        "wfc_bw": u(keys[9], (hidden_size, output_size), s_fc),
        "bfc":    u(keys[10], (1, output_size), s_fc),
    }


if __name__ == "__main__":
    # hidden_size=128 matches the PyTorch module's default and is lane-aligned.
    batch, seq_len, input_size, hidden_size, output_size = 2, 8, 16, 128, 4

    key = jax.random.PRNGKey(0)
    k_x, k_p = jax.random.split(key)
    x = jax.random.normal(k_x, (batch, seq_len, input_size), jnp.float32)
    params = init_params(k_p, input_size, hidden_size, output_size)

    out = birnn2_forward(x, params, fn=None)   # fn=None as in default BiRNN2
    out = jax.block_until_ready(out)

    ref = birnn2_reference(x, params, fn=None)
    assert out.shape == (batch, output_size)
    assert jnp.allclose(out, ref, atol=2e-3, rtol=2e-3), "mismatch vs reference"

    print("KERNEL_OK")
</pallas_src>

<mosaic_0001>
module attributes {stable_mosaic.version = 11 : i64} {
  func.func @_birnn_kernel(%arg0: memref<64x128xbf16, #tpu.memory_space<vmem>>, %arg1: memref<128x128xbf16, #tpu.memory_space<vmem>>, %arg2: memref<128x128xbf16, #tpu.memory_space<vmem>>, %arg3: memref<1x128xf32, #tpu.memory_space<vmem>>, %arg4: memref<128x128xbf16, #tpu.memory_space<vmem>>, %arg5: memref<128x128xbf16, #tpu.memory_space<vmem>>, %arg6: memref<1x128xf32, #tpu.memory_space<vmem>>, %arg7: memref<128x128xbf16, #tpu.memory_space<vmem>>, %arg8: memref<128x128xbf16, #tpu.memory_space<vmem>>, %arg9: memref<1x128xf32, #tpu.memory_space<vmem>>, %arg10: memref<8x128xf32, #tpu.memory_space<vmem>>, %arg11: memref<8x8x128xf32, #tpu.memory_space<vmem>>, %arg12: memref<8x8x128xf32, #tpu.memory_space<vmem>>) attributes {dimension_semantics = [], scalar_prefetch = 0 : i64, scratch_operands = 2 : i64, tpu.core_type = #tpu.core_type<tc>} {
    %c0 = arith.constant 0 : index
    %c0_0 = arith.constant 0 : index
    %0 = vector.load %arg0[%c0, %c0_0] : memref<64x128xbf16, #tpu.memory_space<vmem>>, vector<64x128xbf16>
    %c0_1 = arith.constant 0 : index
    %c0_2 = arith.constant 0 : index
    %1 = vector.load %arg1[%c0_1, %c0_2] : memref<128x128xbf16, #tpu.memory_space<vmem>>, vector<128x128xbf16>
    %cst = arith.constant dense<0.000000e+00> : vector<64x128xf32>
    %2 = tpu.matmul %0, %1, %cst {dimension_numbers = #tpu.dot_dimension_numbers<[1], [0], [0], [1], [0, 0, 1, 1], [], []>} : vector<64x128xbf16>, vector<128x128xbf16>, vector<64x128xf32> -> vector<64x128xf32>
    %c0_3 = arith.constant 0 : index
    %c0_4 = arith.constant 0 : index
    %3 = vector.load %arg4[%c0_3, %c0_4] : memref<128x128xbf16, #tpu.memory_space<vmem>>, vector<128x128xbf16>
    %cst_5 = arith.constant dense<0.000000e+00> : vector<64x128xf32>
    %4 = tpu.matmul %0, %3, %cst_5 {dimension_numbers = #tpu.dot_dimension_numbers<[1], [0], [0], [1], [0, 0, 1, 1], [], []>} : vector<64x128xbf16>, vector<128x128xbf16>, vector<64x128xf32> -> vector<64x128xf32>
    %c0_6 = arith.constant 0 : index
    %c0_7 = arith.constant 0 : index
    %5 = vector.load %arg3[%c0_6, %c0_7] : memref<1x128xf32, #tpu.memory_space<vmem>>, vector<1x128xf32>
    %6 = vector.broadcast %5 : vector<1x128xf32> to vector<64x128xf32>
    %7 = arith.addf %2, %6 : vector<64x128xf32>
    %8 = vector.shape_cast %7 : vector<64x128xf32> to vector<8x8x128xf32>
    %c0_8 = arith.constant 0 : index
    %c0_9 = arith.constant 0 : index
    %c0_10 = arith.constant 0 : index
    %9 = vector.load %arg11[%c0_8, %c0_9, %c0_10] : memref<8x8x128xf32, #tpu.memory_space<vmem>>, vector<8x8x128xf32>
    tpu.vector_store %arg11[%c0_8, %c0_9, %c0_10], %8 {strides = array<i32>} : memref<8x8x128xf32, #tpu.memory_space<vmem>>, vector<8x8x128xf32>,
    %c0_11 = arith.constant 0 : index
    %c0_12 = arith.constant 0 : index
    %10 = vector.load %arg6[%c0_11, %c0_12] : memref<1x128xf32, #tpu.memory_space<vmem>>, vector<1x128xf32>
    %11 = vector.broadcast %10 : vector<1x128xf32> to vector<64x128xf32>
    %12 = arith.addf %4, %11 : vector<64x128xf32>
    %13 = vector.shape_cast %12 : vector<64x128xf32> to vector<8x8x128xf32>
    %c0_13 = arith.constant 0 : index
    %c0_14 = arith.constant 0 : index
    %c0_15 = arith.constant 0 : index
    %14 = vector.load %arg12[%c0_13, %c0_14, %c0_15] : memref<8x8x128xf32, #tpu.memory_space<vmem>>, vector<8x8x128xf32>
    tpu.vector_store %arg12[%c0_13, %c0_14, %c0_15], %13 {strides = array<i32>} : memref<8x8x128xf32, #tpu.memory_space<vmem>>, vector<8x8x128xf32>,
    %c0_16 = arith.constant 0 : index
    %c0_17 = arith.constant 0 : index
    %15 = vector.load %arg2[%c0_16, %c0_17] : memref<128x128xbf16, #tpu.memory_space<vmem>>, vector<128x128xbf16>
    %c0_18 = arith.constant 0 : index
    %c0_19 = arith.constant 0 : index
    %16 = vector.load %arg5[%c0_18, %c0_19] : memref<128x128xbf16, #tpu.memory_space<vmem>>, vector<128x128xbf16>
    %cst_20 = arith.constant 0.000000e+00 : f32
    %17 = vector.broadcast %cst_20 : f32 to vector<8x128xf32>
    %c0_i32 = arith.constant 0 : i32
    %18 = arith.index_cast %c0_i32 : i32 to index
    %c0_21 = arith.constant 0 : index
    %c0_22 = arith.constant 0 : index
    %19 = vector.load %arg11[%18, %c0_21, %c0_22] : memref<8x8x128xf32, #tpu.memory_space<vmem>>, vector<1x8x128xf32>
    %20 = vector.shape_cast %19 : vector<1x8x128xf32> to vector<8x128xf32>
    %21 = arith.truncf %17 : vector<8x128xf32> to vector<8x128xbf16>
    %cst_23 = arith.constant dense<0.000000e+00> : vector<8x128xf32>
    %22 = tpu.matmul %21, %15, %cst_23 {dimension_numbers = #tpu.dot_dimension_numbers<[1], [0], [0], [1], [0, 0, 1, 1], [], []>} : vector<8x128xbf16>, vector<128x128xbf16>, vector<8x128xf32> -> vector<8x128xf32>
    %23 = arith.addf %20, %22 : vector<8x128xf32>
    %24 = math.tanh %23 : vector<8x128xf32>
    %c7_i32 = arith.constant 7 : i32
    %25 = arith.subi %c7_i32, %c0_i32 : i32
    %26 = arith.index_cast %25 : i32 to index
    %c0_24 = arith.constant 0 : index
    %c0_25 = arith.constant 0 : index
    %27 = vector.load %arg12[%26, %c0_24, %c0_25] : memref<8x8x128xf32, #tpu.memory_space<vmem>>, vector<1x8x128xf32>
    %28 = vector.shape_cast %27 : vector<1x8x128xf32> to vector<8x128xf32>
    %29 = arith.truncf %17 : vector<8x128xf32> to vector<8x128xbf16>
    %cst_26 = arith.constant dense<0.000000e+00> : vector<8x128xf32>
    %30 = tpu.matmul %29, %16, %cst_26 {dimension_numbers = #tpu.dot_dimension_numbers<[1], [0], [0], [1], [0, 0, 1, 1], [], []>} : vector<8x128xbf16>, vector<128x128xbf16>, vector<8x128xf32> -> vector<8x128xf32>
    %31 = arith.addf %28, %30 : vector<8x128xf32>
    %32 = math.tanh %31 : vector<8x128xf32>
    %c1_i32 = arith.constant 1 : i32
    %33 = arith.index_cast %c1_i32 : i32 to index
    %c0_27 = arith.constant 0 : index
    %c0_28 = arith.constant 0 : index
    %34 = vector.load %arg11[%33, %c0_27, %c0_28] : memref<8x8x128xf32, #tpu.memory_space<vmem>>, vector<1x8x128xf32>
    %35 = vector.shape_cast %34 : vector<1x8x128xf32> to vector<8x128xf32>
    %36 = arith.truncf %24 : vector<8x128xf32> to vector<8x128xbf16>
    %cst_29 = arith.constant dense<0.000000e+00> : vector<8x128xf32>
    %37 = tpu.matmul %36, %15, %cst_29 {dimension_numbers = #tpu.dot_dimension_numbers<[1], [0], [0], [1], [0, 0, 1, 1], [], []>} : vector<8x128xbf16>, vector<128x128xbf16>, vector<8x128xf32> -> vector<8x128xf32>
    %38 = arith.addf %35, %37 : vector<8x128xf32>
    %39 = math.tanh %38 : vector<8x128xf32>
    %c7_i32_30 = arith.constant 7 : i32
    %40 = arith.subi %c7_i32_30, %c1_i32 : i32
    %41 = arith.index_cast %40 : i32 to index
    %c0_31 = arith.constant 0 : index
    %c0_32 = arith.constant 0 : index
    %42 = vector.load %arg12[%41, %c0_31, %c0_32] : memref<8x8x128xf32, #tpu.memory_space<vmem>>, vector<1x8x128xf32>
    %43 = vector.shape_cast %42 : vector<1x8x128xf32> to vector<8x128xf32>
    %44 = arith.truncf %32 : vector<8x128xf32> to vector<8x128xbf16>
    %cst_33 = arith.constant dense<0.000000e+00> : vector<8x128xf32>
    %45 = tpu.matmul %44, %16, %cst_33 {dimension_numbers = #tpu.dot_dimension_numbers<[1], [0], [0], [1], [0, 0, 1, 1], [], []>} : vector<8x128xbf16>, vector<128x128xbf16>, vector<8x128xf32> -> vector<8x128xf32>
    %46 = arith.addf %43, %45 : vector<8x128xf32>
    %47 = math.tanh %46 : vector<8x128xf32>
    %c2_i32 = arith.constant 2 : i32
    %48 = arith.index_cast %c2_i32 : i32 to index
    %c0_34 = arith.constant 0 : index
    %c0_35 = arith.constant 0 : index
    %49 = vector.load %arg11[%48, %c0_34, %c0_35] : memref<8x8x128xf32, #tpu.memory_space<vmem>>, vector<1x8x128xf32>
    %50 = vector.shape_cast %49 : vector<1x8x128xf32> to vector<8x128xf32>
    %51 = arith.truncf %39 : vector<8x128xf32> to vector<8x128xbf16>
    %cst_36 = arith.constant dense<0.000000e+00> : vector<8x128xf32>
    %52 = tpu.matmul %51, %15, %cst_36 {dimension_numbers = #tpu.dot_dimension_numbers<[1], [0], [0], [1], [0, 0, 1, 1], [], []>} : vector<8x128xbf16>, vector<128x128xbf16>, vector<8x128xf32> -> vector<8x128xf32>
    %53 = arith.addf %50, %52 : vector<8x128xf32>
    %54 = math.tanh %53 : vector<8x128xf32>
    %c7_i32_37 = arith.constant 7 : i32
    %55 = arith.subi %c7_i32_37, %c2_i32 : i32
    %56 = arith.index_cast %55 : i32 to index
    %c0_38 = arith.constant 0 : index
    %c0_39 = arith.constant 0 : index
    %57 = vector.load %arg12[%56, %c0_38, %c0_39] : memref<8x8x128xf32, #tpu.memory_space<vmem>>, vector<1x8x128xf32>
    %58 = vector.shape_cast %57 : vector<1x8x128xf32> to vector<8x128xf32>
    %59 = arith.truncf %47 : vector<8x128xf32> to vector<8x128xbf16>
    %cst_40 = arith.constant dense<0.000000e+00> : vector<8x128xf32>
    %60 = tpu.matmul %59, %16, %cst_40 {dimension_numbers = #tpu.dot_dimension_numbers<[1], [0], [0], [1], [0, 0, 1, 1], [], []>} : vector<8x128xbf16>, vector<128x128xbf16>, vector<8x128xf32> -> vector<8x128xf32>
    %61 = arith.addf %58, %60 : vector<8x128xf32>
    %62 = math.tanh %61 : vector<8x128xf32>
    %c3_i32 = arith.constant 3 : i32
    %63 = arith.index_cast %c3_i32 : i32 to index
    %c0_41 = arith.constant 0 : index
    %c0_42 = arith.constant 0 : index
    %64 = vector.load %arg11[%63, %c0_41, %c0_42] : memref<8x8x128xf32, #tpu.memory_space<vmem>>, vector<1x8x128xf32>
    %65 = vector.shape_cast %64 : vector<1x8x128xf32> to vector<8x128xf32>
    %66 = arith.truncf %54 : vector<8x128xf32> to vector<8x128xbf16>
    %cst_43 = arith.constant dense<0.000000e+00> : vector<8x128xf32>
    %67 = tpu.matmul %66, %15, %cst_43 {dimension_numbers = #tpu.dot_dimension_numbers<[1], [0], [0], [1], [0, 0, 1, 1], [], []>} : vector<8x128xbf16>, vector<128x128xbf16>, vector<8x128xf32> -> vector<8x128xf32>
    %68 = arith.addf %65, %67 : vector<8x128xf32>
    %69 = math.tanh %68 : vector<8x128xf32>
    %c7_i32_44 = arith.constant 7 : i32
    %70 = arith.subi %c7_i32_44, %c3_i32 : i32
    %71 = arith.index_cast %70 : i32 to index
    %c0_45 = arith.constant 0 : index
    %c0_46 = arith.constant 0 : index
    %72 = vector.load %arg12[%71, %c0_45, %c0_46] : memref<8x8x128xf32, #tpu.memory_space<vmem>>, vector<1x8x128xf32>
    %73 = vector.shape_cast %72 : vector<1x8x128xf32> to vector<8x128xf32>
    %74 = arith.truncf %62 : vector<8x128xf32> to vector<8x128xbf16>
    %cst_47 = arith.constant dense<0.000000e+00> : vector<8x128xf32>
    %75 = tpu.matmul %74, %16, %cst_47 {dimension_numbers = #tpu.dot_dimension_numbers<[1], [0], [0], [1], [0, 0, 1, 1], [], []>} : vector<8x128xbf16>, vector<128x128xbf16>, vector<8x128xf32> -> vector<8x128xf32>
    %76 = arith.addf %73, %75 : vector<8x128xf32>
    %77 = math.tanh %76 : vector<8x128xf32>
    %c4_i32 = arith.constant 4 : i32
    %78 = arith.index_cast %c4_i32 : i32 to index
    %c0_48 = arith.constant 0 : index
    %c0_49 = arith.constant 0 : index
    %79 = vector.load %arg11[%78, %c0_48, %c0_49] : memref<8x8x128xf32, #tpu.memory_space<vmem>>, vector<1x8x128xf32>
    %80 = vector.shape_cast %79 : vector<1x8x128xf32> to vector<8x128xf32>
    %81 = arith.truncf %69 : vector<8x128xf32> to vector<8x128xbf16>
    %cst_50 = arith.constant dense<0.000000e+00> : vector<8x128xf32>
    %82 = tpu.matmul %81, %15, %cst_50 {dimension_numbers = #tpu.dot_dimension_numbers<[1], [0], [0], [1], [0, 0, 1, 1], [], []>} : vector<8x128xbf16>, vector<128x128xbf16>, vector<8x128xf32> -> vector<8x128xf32>
    %83 = arith.addf %80, %82 : vector<8x128xf32>
    %84 = math.tanh %83 : vector<8x128xf32>
    %c7_i32_51 = arith.constant 7 : i32
    %85 = arith.subi %c7_i32_51, %c4_i32 : i32
    %86 = arith.index_cast %85 : i32 to index
    %c0_52 = arith.constant 0 : index
    %c0_53 = arith.constant 0 : index
    %87 = vector.load %arg12[%86, %c0_52, %c0_53] : memref<8x8x128xf32, #tpu.memory_space<vmem>>, vector<1x8x128xf32>
    %88 = vector.shape_cast %87 : vector<1x8x128xf32> to vector<8x128xf32>
    %89 = arith.truncf %77 : vector<8x128xf32> to vector<8x128xbf16>
    %cst_54 = arith.constant dense<0.000000e+00> : vector<8x128xf32>
    %90 = tpu.matmul %89, %16, %cst_54 {dimension_numbers = #tpu.dot_dimension_numbers<[1], [0], [0], [1], [0, 0, 1, 1], [], []>} : vector<8x128xbf16>, vector<128x128xbf16>, vector<8x128xf32> -> vector<8x128xf32>
    %91 = arith.addf %88, %90 : vector<8x128xf32>
    %92 = math.tanh %91 : vector<8x128xf32>
    %c5_i32 = arith.constant 5 : i32
    %93 = arith.index_cast %c5_i32 : i32 to index
    %c0_55 = arith.constant 0 : index
    %c0_56 = arith.constant 0 : index
    %94 = vector.load %arg11[%93, %c0_55, %c0_56] : memref<8x8x128xf32, #tpu.memory_space<vmem>>, vector<1x8x128xf32>
    %95 = vector.shape_cast %94 : vector<1x8x128xf32> to vector<8x128xf32>
    %96 = arith.truncf %84 : vector<8x128xf32> to vector<8x128xbf16>
    %cst_57 = arith.constant dense<0.000000e+00> : vector<8x128xf32>
    %97 = tpu.matmul %96, %15, %cst_57 {dimension_numbers = #tpu.dot_dimension_numbers<[1], [0], [0], [1], [0, 0, 1, 1], [], []>} : vector<8x128xbf16>, vector<128x128xbf16>, vector<8x128xf32> -> vector<8x128xf32>
    %98 = arith.addf %95, %97 : vector<8x128xf32>
    %99 = math.tanh %98 : vector<8x128xf32>
    %c7_i32_58 = arith.constant 7 : i32
    %100 = arith.subi %c7_i32_58, %c5_i32 : i32
    %101 = arith.index_cast %100 : i32 to index
    %c0_59 = arith.constant 0 : index
    %c0_60 = arith.constant 0 : index
    %102 = vector.load %arg12[%101, %c0_59, %c0_60] : memref<8x8x128xf32, #tpu.memory_space<vmem>>, vector<1x8x128xf32>
    %103 = vector.shape_cast %102 : vector<1x8x128xf32> to vector<8x128xf32>
    %104 = arith.truncf %92 : vector<8x128xf32> to vector<8x128xbf16>
    %cst_61 = arith.constant dense<0.000000e+00> : vector<8x128xf32>
    %105 = tpu.matmul %104, %16, %cst_61 {dimension_numbers = #tpu.dot_dimension_numbers<[1], [0], [0], [1], [0, 0, 1, 1], [], []>} : vector<8x128xbf16>, vector<128x128xbf16>, vector<8x128xf32> -> vector<8x128xf32>
    %106 = arith.addf %103, %105 : vector<8x128xf32>
    %107 = math.tanh %106 : vector<8x128xf32>
    %c6_i32 = arith.constant 6 : i32
    %108 = arith.index_cast %c6_i32 : i32 to index
    %c0_62 = arith.constant 0 : index
    %c0_63 = arith.constant 0 : index
    %109 = vector.load %arg11[%108, %c0_62, %c0_63] : memref<8x8x128xf32, #tpu.memory_space<vmem>>, vector<1x8x128xf32>
    %110 = vector.shape_cast %109 : vector<1x8x128xf32> to vector<8x128xf32>
    %111 = arith.truncf %99 : vector<8x128xf32> to vector<8x128xbf16>
    %cst_64 = arith.constant dense<0.000000e+00> : vector<8x128xf32>
    %112 = tpu.matmul %111, %15, %cst_64 {dimension_numbers = #tpu.dot_dimension_numbers<[1], [0], [0], [1], [0, 0, 1, 1], [], []>} : vector<8x128xbf16>, vector<128x128xbf16>, vector<8x128xf32> -> vector<8x128xf32>
    %113 = arith.addf %110, %112 : vector<8x128xf32>
    %114 = math.tanh %113 : vector<8x128xf32>
    %c7_i32_65 = arith.constant 7 : i32
    %115 = arith.subi %c7_i32_65, %c6_i32 : i32
    %116 = arith.index_cast %115 : i32 to index
    %c0_66 = arith.constant 0 : index
    %c0_67 = arith.constant 0 : index
    %117 = vector.load %arg12[%116, %c0_66, %c0_67] : memref<8x8x128xf32, #tpu.memory_space<vmem>>, vector<1x8x128xf32>
    %118 = vector.shape_cast %117 : vector<1x8x128xf32> to vector<8x128xf32>
    %119 = arith.truncf %107 : vector<8x128xf32> to vector<8x128xbf16>
    %cst_68 = arith.constant dense<0.000000e+00> : vector<8x128xf32>
    %120 = tpu.matmul %119, %16, %cst_68 {dimension_numbers = #tpu.dot_dimension_numbers<[1], [0], [0], [1], [0, 0, 1, 1], [], []>} : vector<8x128xbf16>, vector<128x128xbf16>, vector<8x128xf32> -> vector<8x128xf32>
    %121 = arith.addf %118, %120 : vector<8x128xf32>
    %122 = math.tanh %121 : vector<8x128xf32>
    %c7_i32_69 = arith.constant 7 : i32
    %123 = arith.index_cast %c7_i32_69 : i32 to index
    %c0_70 = arith.constant 0 : index
    %c0_71 = arith.constant 0 : index
    %124 = vector.load %arg11[%123, %c0_70, %c0_71] : memref<8x8x128xf32, #tpu.memory_space<vmem>>, vector<1x8x128xf32>
    %125 = vector.shape_cast %124 : vector<1x8x128xf32> to vector<8x128xf32>
    %126 = arith.truncf %114 : vector<8x128xf32> to vector<8x128xbf16>
    %cst_72 = arith.constant dense<0.000000e+00> : vector<8x128xf32>
    %127 = tpu.matmul %126, %15, %cst_72 {dimension_numbers = #tpu.dot_dimension_numbers<[1], [0], [0], [1], [0, 0, 1, 1], [], []>} : vector<8x128xbf16>, vector<128x128xbf16>, vector<8x128xf32> -> vector<8x128xf32>
    %128 = arith.addf %125, %127 : vector<8x128xf32>
    %129 = math.tanh %128 : vector<8x128xf32>
    %c7_i32_73 = arith.constant 7 : i32
    %130 = arith.subi %c7_i32_73, %c7_i32_69 : i32
    %131 = arith.index_cast %130 : i32 to index
    %c0_74 = arith.constant 0 : index
    %c0_75 = arith.constant 0 : index
    %132 = vector.load %arg12[%131, %c0_74, %c0_75] : memref<8x8x128xf32, #tpu.memory_space<vmem>>, vector<1x8x128xf32>
    %133 = vector.shape_cast %132 : vector<1x8x128xf32> to vector<8x128xf32>
    %134 = arith.truncf %122 : vector<8x128xf32> to vector<8x128xbf16>
    %cst_76 = arith.constant dense<0.000000e+00> : vector<8x128xf32>
    %135 = tpu.matmul %134, %16, %cst_76 {dimension_numbers = #tpu.dot_dimension_numbers<[1], [0], [0], [1], [0, 0, 1, 1], [], []>} : vector<8x128xbf16>, vector<128x128xbf16>, vector<8x128xf32> -> vector<8x128xf32>
    %136 = arith.addf %133, %135 : vector<8x128xf32>
    %137 = math.tanh %136 : vector<8x128xf32>
    %c8_i32 = arith.constant 8 : i32
    %138 = arith.truncf %129 : vector<8x128xf32> to vector<8x128xbf16>
    %c0_77 = arith.constant 0 : index
    %c0_78 = arith.constant 0 : index
    %139 = vector.load %arg7[%c0_77, %c0_78] : memref<128x128xbf16, #tpu.memory_space<vmem>>, vector<128x128xbf16>
    %cst_79 = arith.constant dense<0.000000e+00> : vector<8x128xf32>
    %140 = tpu.matmul %138, %139, %cst_79 {dimension_numbers = #tpu.dot_dimension_numbers<[1], [0], [0], [1], [0, 0, 1, 1], [], []>} : vector<8x128xbf16>, vector<128x128xbf16>, vector<8x128xf32> -> vector<8x128xf32>
    %141 = arith.truncf %137 : vector<8x128xf32> to vector<8x128xbf16>
    %c0_80 = arith.constant 0 : index
    %c0_81 = arith.constant 0 : index
    %142 = vector.load %arg8[%c0_80, %c0_81] : memref<128x128xbf16, #tpu.memory_space<vmem>>, vector<128x128xbf16>
    %cst_82 = arith.constant dense<0.000000e+00> : vector<8x128xf32>
    %143 = tpu.matmul %141, %142, %cst_82 {dimension_numbers = #tpu.dot_dimension_numbers<[1], [0], [0], [1], [0, 0, 1, 1], [], []>} : vector<8x128xbf16>, vector<128x128xbf16>, vector<8x128xf32> -> vector<8x128xf32>
    %144 = arith.addf %140, %143 : vector<8x128xf32>
    %c0_83 = arith.constant 0 : index
    %c0_84 = arith.constant 0 : index
    %145 = vector.load %arg9[%c0_83, %c0_84] : memref<1x128xf32, #tpu.memory_space<vmem>>, vector<1x128xf32>
    %146 = vector.broadcast %145 : vector<1x128xf32> to vector<8x128xf32>
    %147 = arith.addf %144, %146 : vector<8x128xf32>
    %c0_85 = arith.constant 0 : index
    %c0_86 = arith.constant 0 : index
    %148 = vector.load %arg10[%c0_85, %c0_86] : memref<8x128xf32, #tpu.memory_space<vmem>>, vector<8x128xf32>
    tpu.vector_store %arg10[%c0_85, %c0_86], %147 {strides = array<i32>} : memref<8x128xf32, #tpu.memory_space<vmem>>, vector<8x128xf32>,
    return
  }
}

</mosaic_0001>

<bundles_post_ra>
// kernel: tpu_custom_call.1
= control target key start
LH: loop header
LB: loop body
LE: loop exit
PB: predicated region body
PF: predicated region fallthrough
CT: control target
= control target key end

     0   :  { %15 = vsyncpa [#allocation5], 0  ;;  %s3062_s0 = inlined_call_operand.hbm [shape: bf16[64,128], index: 0, kind: input, shape index: {}]   ;;  %s3063_s1 = inlined_call_operand.hbm [shape: bf16[128,128], index: 1, kind: input, shape index: {}]   ;;  %s3064_s2 = inlined_call_operand.hbm [shape: bf16[128,128], index: 2, kind: input, shape index: {}]   ;;  %s3065_s3 = inlined_call_operand.vmem [shape: f32[1,128], index: 3, kind: input, shape index: {}]   ;;  %s3066_s4 = inlined_call_operand.hbm [shape: bf16[128,128], index: 4, kind: input, shape index: {}]   ;;  %s3067_s5 = inlined_call_operand.hbm [shape: bf16[128,128], index: 5, kind: input, shape index: {}]   ;;  %s3068_s6 = inlined_call_operand.vmem [shape: f32[1,128], index: 6, kind: input, shape index: {}]   ;;  %s3069_s7 = inlined_call_operand.hbm [shape: bf16[128,128], index: 7, kind: input, shape index: {}]   ;;  %s3070_s8 = inlined_call_operand.hbm [shape: bf16[128,128], index: 8, kind: input, shape index: {}]   ;;  %s3071_s9 = inlined_call_operand.vmem [shape: f32[1,128], index: 9, kind: input, shape index: {}]   ;;  %s3072_s10 = inlined_call_operand.hbm [shape: f32[8,128], index: 10, kind: output, shape index: {}]  }
   0x1   :  { %16 = vsyncpa [#allocation8], 0 }
   0x2   :  { %17 = vsyncpa [#allocation11], 0 }
   0x3   :  { %18 = vsyncpa [#allocation14], 0 }
   0x4   :  { %19 = vsyncpa [#allocation6], 0  ;;  %s2465_s13 = smov [#allocation7]   ;;  %s2466_s15 = smov [#allocation10]  }
   0x5   :  { %s37_s14 = sshll.u32 %s2465_s13, 4  ;;  %s63_s16 = sshll.u32 %s2466_s15, 4  ;;  %s38_s14 = int_to_ptr.vmem [resolvable:$true] %s37_s14  ;;  %s2533_s16 = int_to_ptr.vmem [resolvable:$true] %s63_s16 }
   0x6   :  { %s2279_s19 = scalar_lea.hbm %s3063_s1, 1024 }
   0x7   :  { %p2280_p0 = scmp.ne.s32.totalorder %s3063_s1, %s2279_s19  ;;  %p2283_p1 = scmp.lt.u32.totalorder %s2279_s19, %s3063_s1 }
   0x9   :  { %p2285_p2 = pnand %p2283_p1, %p2280_p0 }
   0xb   :  { %2288 = shalt.err (!%p2285_p2)
}
   0xc   :  { %s2289_s24 = scalar_lea.vmem %s38_s14, 1024  ;;  %p2294_p4 = scmp.lt.s32.totalorder %s38_s14, %s38_s14 }
   0xd   :  { %p2290_p3 = scmp.ne.s32.totalorder %s38_s14, %s2289_s24  ;;  %p2295_p5 = scmp.lt.s32.totalorder %s2289_s24, %s2289_s24 }
   0xf   :  { %p2296_p6 = por %p2295_p5, %p2294_p4 }
  0x11   :  { %p2297_p7 = pnand %p2296_p6, %p2290_p3 }
  0x13   :  { %2300 = shalt.err (!%p2297_p7)
}
  0x14   :  { %s2467_s25 = smov 64   ;;  %s2468_s26 = smov 4  }
  0x15   :  { %43 = dma.hbm_to_vmem [thread:$0]  %s3063_s1, 1024, %s38_s14, [#allocation8], %s2467_s25, %s2467_s25, %s2468_s26  }
  0x16   :  { %s2301_s11 = scalar_lea.hbm %s3066_s4, 1024 }
  0x17   :  { %p2302_p8 = scmp.ne.s32.totalorder %s3066_s4, %s2301_s11  ;;  %p2305_p9 = scmp.lt.u32.totalorder %s2301_s11, %s3066_s4 }
  0x19   :  { %p2307_p10 = pnand %p2305_p9, %p2302_p8 }
  0x1b   :  { %2310 = shalt.err (!%p2307_p10)
}
  0x1c   :  { %s2311_s18 = scalar_lea.vmem %s2533_s16, 1024  ;;  %p2316_p12 = scmp.lt.s32.totalorder %s2533_s16, %s2533_s16 }
  0x1d   :  { %p2312_p11 = scmp.ne.s32.totalorder %s2533_s16, %s2311_s18  ;;  %p2317_p13 = scmp.lt.s32.totalorder %s2311_s18, %s2311_s18 }
  0x1f   :  { %p2318_p0 = por %p2317_p13, %p2316_p12 }
  0x21   :  { %p2319_p1 = pnand %p2318_p0, %p2312_p11 }
  0x23   :  { %2322 = shalt.err (!%p2319_p1)
}
  0x24   :  { %69 = dma.hbm_to_vmem [thread:$0]  %s3066_s4, 1024, %s2533_s16, [#allocation11], %s2467_s25, %s2467_s25, %s2468_s26  }
  0x25   :  { %s2469_s19 = smov [#allocation13]   ;;  %s2470_s21 = smov [#allocation4]  }
  0x26   :  { %s89_s20 = sshll.u32 %s2469_s19, 4  ;;  %s25_s22 = sshll.u32 %s2470_s21, 4  ;;  %s90_s20 = int_to_ptr.vmem [resolvable:$true] %s89_s20  ;;  %s2570_s22 = int_to_ptr.vmem [resolvable:$true] %s25_s22 }
  0x27   :  { %s2323_s27 = scalar_lea.hbm %s3069_s7, 1024 }
  0x28   :  { %p2324_p2 = scmp.ne.s32.totalorder %s3069_s7, %s2323_s27  ;;  %p2327_p3 = scmp.lt.u32.totalorder %s2323_s27, %s3069_s7 }
  0x2a   :  { %p2329_p4 = pnand %p2327_p3, %p2324_p2 }
  0x2c   :  { %2332 = shalt.err (!%p2329_p4)
}
  0x2d   :  { %s2333_s4 = scalar_lea.vmem %s90_s20, 1024  ;;  %p2338_p6 = scmp.lt.s32.totalorder %s90_s20, %s90_s20 }
  0x2e   :  { %p2334_p5 = scmp.ne.s32.totalorder %s90_s20, %s2333_s4  ;;  %p2339_p7 = scmp.lt.s32.totalorder %s2333_s4, %s2333_s4 }
  0x30   :  { %p2340_p8 = por %p2339_p7, %p2338_p6 }
  0x32   :  { %p2341_p9 = pnand %p2340_p8, %p2334_p5 }
  0x34   :  { %2344 = shalt.err (!%p2341_p9)
}
  0x35   :  { %95 = dma.hbm_to_vmem [thread:$0]  %s3069_s7, 1024, %s90_s20, [#allocation14], %s2467_s25, %s2467_s25, %s2468_s26  }
  0x36   :  { %s2345_s17 = scalar_lea.hbm %s3062_s0, 512 }
  0x37   :  { %p2346_p10 = scmp.ne.s32.totalorder %s3062_s0, %s2345_s17  ;;  %p2349_p11 = scmp.lt.u32.totalorder %s2345_s17, %s3062_s0 }
  0x39   :  { %p2351_p12 = pnand %p2349_p11, %p2346_p10 }
  0x3b   :  { %2354 = shalt.err (!%p2351_p12)
}
  0x3c   :  { %s2355_s21 = scalar_lea.vmem %s2570_s22, 512  ;;  %p2360_p0 = scmp.lt.s32.totalorder %s2570_s22, %s2570_s22 }
  0x3d   :  { %p2356_p13 = scmp.ne.s32.totalorder %s2570_s22, %s2355_s21  ;;  %p2361_p1 = scmp.lt.s32.totalorder %s2355_s21, %s2355_s21 }
  0x3f   :  { %p2362_p2 = por %p2361_p1, %p2360_p0 }
  0x41   :  { %p2363_p3 = pnand %p2362_p2, %p2356_p13 }
  0x43   :  { %2366 = shalt.err (!%p2363_p3)
}
  0x44   :  { %31 = dma.hbm_to_vmem [thread:$0]  %s3062_s0, 512, %s2570_s22, [#allocation5], %s2467_s25, %s2467_s25, %s2468_s26  }
  0x45   :  { %s2471_s23 = smov [#allocation9]   ;;  %s2472_s27 = smov [#allocation12]  }
  0x46   :  { %s49_s24 = sshll.u32 %s2471_s23, 4  ;;  %s75_s28 = sshll.u32 %s2472_s27, 4  ;;  %s50_s24 = int_to_ptr.vmem [resolvable:$true] %s49_s24  ;;  %s2607_s28 = int_to_ptr.vmem [resolvable:$true] %s75_s28 }
  0x47   :  { %s2367_s11 = scalar_lea.hbm %s3064_s2, 1024 }
  0x48   :  { %p2368_p4 = scmp.ne.s32.totalorder %s3064_s2, %s2367_s11  ;;  %p2371_p5 = scmp.lt.u32.totalorder %s2367_s11, %s3064_s2 }
  0x4a   :  { %p2373_p6 = pnand %p2371_p5, %p2368_p4 }
  0x4c   :  { %2376 = shalt.err (!%p2373_p6)
}
  0x4d   :  { %s2377_s0 = scalar_lea.vmem %s50_s24, 1024  ;;  %p2382_p8 = scmp.lt.s32.totalorder %s50_s24, %s50_s24 }
  0x4e   :  { %p2378_p7 = scmp.ne.s32.totalorder %s50_s24, %s2377_s0  ;;  %p2383_p9 = scmp.lt.s32.totalorder %s2377_s0, %s2377_s0 }
  0x50   :  { %p2384_p10 = por %p2383_p9, %p2382_p8 }
  0x52   :  { %p2385_p11 = pnand %p2384_p10, %p2378_p7 }
  0x54   :  { %2388 = shalt.err (!%p2385_p11)
}
  0x55   :  { %55 = dma.hbm_to_vmem [thread:$0]  %s3064_s2, 1024, %s50_s24, [#allocation8], %s2467_s25, %s2467_s25, %s2468_s26  }
  0x56   :  { %s2389_s1 = scalar_lea.hbm %s3067_s5, 1024 }
  0x57   :  { %p2390_p12 = scmp.ne.s32.totalorder %s3067_s5, %s2389_s1  ;;  %p2393_p13 = scmp.lt.u32.totalorder %s2389_s1, %s3067_s5 }
  0x59   :  { %p2395_p0 = pnand %p2393_p13, %p2390_p12 }
  0x5b   :  { %2398 = shalt.err (!%p2395_p0)
}
  0x5c   :  { %s2399_s20 = scalar_lea.vmem %s2607_s28, 1024  ;;  %p2404_p2 = scmp.lt.s32.totalorder %s2607_s28, %s2607_s28 }
  0x5d   :  { %p2400_p1 = scmp.ne.s32.totalorder %s2607_s28, %s2399_s20  ;;  %p2405_p3 = scmp.lt.s32.totalorder %s2399_s20, %s2399_s20 }
  0x5f   :  { %p2406_p4 = por %p2405_p3, %p2404_p2 }
  0x61   :  { %p2407_p5 = pnand %p2406_p4, %p2400_p1 }
  0x63   :  { %2410 = shalt.err (!%p2407_p5)
}
  0x64   :  { %81 = dma.hbm_to_vmem [thread:$0]  %s3067_s5, 1024, %s2607_s28, [#allocation11], %s2467_s25, %s2467_s25, %s2468_s26  }
  0x65   :  { %s2473_s24 = smov [#allocation15]   ;;  %s2411_s11 = scalar_lea.hbm %s3070_s8, 1024 }
  0x66   :  { %s101_s27 = sshll.u32 %s2473_s24, 4  ;;  %p2412_p6 = scmp.ne.s32.totalorder %s3070_s8, %s2411_s11  ;;  %s102_s27 = int_to_ptr.vmem [resolvable:$true] %s101_s27 }
  0x67   :  { %p2415_p7 = scmp.lt.u32.totalorder %s2411_s11, %s3070_s8 }
  0x69   :  { %p2417_p8 = pnand %p2415_p7, %p2412_p6 }
  0x6b   :  { %2420 = shalt.err (!%p2417_p8)
}
  0x6c   :  { %s2421_s0 = scalar_lea.vmem %s102_s27, 1024  ;;  %p2426_p10 = scmp.lt.s32.totalorder %s102_s27, %s102_s27 }
  0x6d   :  { %p2422_p9 = scmp.ne.s32.totalorder %s102_s27, %s2421_s0  ;;  %p2427_p11 = scmp.lt.s32.totalorder %s2421_s0, %s2421_s0 }
  0x6f   :  { %p2428_p12 = por %p2427_p11, %p2426_p10 }
  0x71   :  { %p2429_p13 = pnand %p2428_p12, %p2422_p9 }
  0x73   :  { %2432 = shalt.err (!%p2429_p13)
}
  0x74   :  { %107 = dma.hbm_to_vmem [thread:$0]  %s3070_s8, 1024, %s102_s27, [#allocation14], %s2467_s25, %s2467_s25, %s2468_s26  }
  0x75   :  { %2455 = dma.done.wait [#allocation5], 512  }
  0x76   :  { %2456 = vsyncadd [#allocation5], 4294966784 }
  0x77   :  { %2457 = dma.done.wait [#allocation8], 2048  }
  0x78   :  { %2458 = vsyncadd [#allocation8], 4294965248 }
  0x79   :  { %2459 = dma.done.wait [#allocation11], 2048  }
  0x7a   :  { %2460 = vsyncadd [#allocation11], 4294965248 }
  0x7b   :  { %2461 = dma.done.wait [#allocation14], 2048  }
  0x7c   :  { %2462 = vsyncadd [#allocation14], 4294965248  ;;  %v2195_v0 = vld [vmem:[#allocation7] sm:$0xff]   ;;  %v2197_v2 = vld [vmem:[#allocation7 + $0x8] sm:$0xff]   ;;  %v2474_v19 = vmov 0.0   ;;  %vm2475_vm0 = vmmov 0  }
  0x7d   :  { %v2196_v1 = vld [vmem:[#allocation10] sm:$0xff]   ;;  %1774 = vmatprep.subr.bf16.mxu0 %v2195_v0  ;;  %v2198_v3 = vld [vmem:[#allocation10 + $0x8] sm:$0xff]   ;;  %v2199_v4 = vld [vmem:[#allocation7 + $0x10] sm:$0xff]   ;;  %v2476_v37 = vmov 0   ;;  %s2477_s15 = smov [#allocation16]  }
  0x7e   :  { %1798 = vmatprep.subr.bf16.mxu1 %v2196_v1  ;;  %1775 = vmatpush3.bf16.msra.mxu0 %v2195_v0  ;;  %v2200_v5 = vld [vmem:[#allocation10 + $0x10] sm:$0xff]   ;;  %v2201_v6 = vld [vmem:[#allocation7 + $0x18] sm:$0xff]   ;;  %v2203_v8 = vld [vmem:[#allocation7 + $0x20] sm:$0xff]   ;;  %s1521_s17 = sshll.u32 %s2477_s15, 4  ;;  %s1522_s17 = int_to_ptr.vmem [resolvable:$true] %s1521_s17 }
  0x7f   :  { %1799 = vmatpush3.bf16.msra.mxu1 %v2196_v1  ;;  %1776 = vmatprep.subr.bf16.mxu0 %v2197_v2  ;;  %v2202_v7 = vld [vmem:[#allocation10 + $0x18] sm:$0xff]   ;;  %v2204_v9 = vld [vmem:[#allocation10 + $0x20] sm:$0xff]   ;;  %v2205_v10 = vld [vmem:[#allocation7 + $0x28] sm:$0xff]   ;;  %s2433_s18 = scalar_lea.vmem %s1522_s17, 128  ;;  %p2438_p1 = scmp.lt.s32.totalorder %s1522_s17, %s1522_s17 }
  0x80   :  { %1800 = vmatprep.subr.bf16.mxu1 %v2198_v3  ;;  %v2211_v11 = vld [vmem:[#allocation4] sm:$0xff]   ;;  %v2206_v12 = vld [vmem:[#allocation10 + $0x28] sm:$0xff]   ;;  %v2207_v13 = vld [vmem:[#allocation7 + $0x30] sm:$0xff]   ;;  %p2434_p0 = scmp.ne.s32.totalorder %s1522_s17, %s2433_s18  ;;  %p2439_p2 = scmp.lt.s32.totalorder %s2433_s18, %s2433_s18 }
  0x81   :  { %1790 = vmatprep.mubr.bf16.mxu0 %v2211_v11  ;;  %1814 = vmatprep.mubr.bf16.mxu1 %v2211_v11  ;;  %v2208_v14 = vld [vmem:[#allocation10 + $0x30] sm:$0xff]   ;;  %v2209_v15 = vld [vmem:[#allocation7 + $0x38] sm:$0xff]   ;;  %v2212_v17 = vld [vmem:[#allocation4 + $0x8] sm:$0xff]  }
  0x82   :  { %1777 = vmatpush3.bf16.msra.mxu0 %v2197_v2  ;;  %v2210_v16 = vld [vmem:[#allocation10 + $0x38] sm:$0xff]   ;;  %v2659_v18 = vld [vmem:[#allocation9] sm:$0xff]   ;;  %v2223_v21 = vld [vmem:[#allocation4 + $0x10] sm:$0xff]   ;;  %p2440_p3 = por %p2439_p2, %p2438_p1 }
  0x83   :  { %1801 = vmatpush3.bf16.msra.mxu1 %v2198_v3  ;;  %1778 = vmatprep.subr.bf16.mxu0 %v2199_v4  ;;  %v2662_v20 = vld [vmem:[#allocation12] sm:$0xff]   ;;  %v2665_v22 = vld [vmem:[#allocation9 + $0x8] sm:$0xff]   ;;  %v2224_v24 = vld [vmem:[#allocation4 + $0x18] sm:$0xff]  }
  0x84   :  { %1802 = vmatprep.subr.bf16.mxu1 %v2200_v5  ;;  %v2668_v23 = vld [vmem:[#allocation12 + $0x8] sm:$0xff]   ;;  %v2673_v25 = vld [vmem:[#allocation9 + $0x10] sm:$0xff]   ;;  %v2681_v27 = vld [vmem:[#allocation9 + $0x18] sm:$0xff]   ;;  %p2441_p4 = pnand %p2440_p3, %p2434_p0 }
  0x85   :  { %v2675_v26 = vld [vmem:[#allocation12 + $0x10] sm:$0xff]   ;;  %v2683_v28 = vld [vmem:[#allocation12 + $0x18] sm:$0xff]   ;;  %v2694_v29 = vld [vmem:[#allocation9 + $0x20] sm:$0xff]  }
  0x86   :  { %1779 = vmatpush3.bf16.msra.mxu0 %v2199_v4  ;;  %v2698_v30 = vld [vmem:[#allocation12 + $0x20] sm:$0xff]   ;;  %v2702_v31 = vld [vmem:[#allocation9 + $0x28] sm:$0xff]   ;;  %v2710_v33 = vld [vmem:[#allocation9 + $0x30] sm:$0xff]  }
  0x87   :  { %1803 = vmatpush3.bf16.msra.mxu1 %v2200_v5  ;;  %1780 = vmatprep.subr.bf16.mxu0 %v2201_v6  ;;  %v2706_v32 = vld [vmem:[#allocation12 + $0x28] sm:$0xff]   ;;  %v2714_v34 = vld [vmem:[#allocation12 + $0x30] sm:$0xff]   ;;  %v2718_v35 = vld [vmem:[#allocation9 + $0x38] sm:$0xff]  }
  0x88   :  { %1804 = vmatprep.subr.bf16.mxu1 %v2202_v7  ;;  %v2722_v36 = vld [vmem:[#allocation12 + $0x38] sm:$0xff]   ;;  %v1533_v38 = vld [vmem:[%s3065_s3] ss:$0 sm:$0xff] }
  0x89   :  { %v1546_v39 = vld [vmem:[%s3068_s6] ss:$0 sm:$0xff] }
  0x8a   :  { %1781 = vmatpush3.bf16.msra.mxu0 %v2201_v6 }
  0x8b   :  { %1805 = vmatpush3.bf16.msra.mxu1 %v2202_v7  ;;  %1782 = vmatprep.subr.bf16.mxu0 %v2203_v8 }
  0x8c   :  { %1806 = vmatprep.subr.bf16.mxu1 %v2204_v9 }
  0x8e   :  { %1783 = vmatpush3.bf16.msra.mxu0 %v2203_v8 }
  0x8f   :  { %1807 = vmatpush3.bf16.msra.mxu1 %v2204_v9  ;;  %1784 = vmatprep.subr.bf16.mxu0 %v2205_v10 }
  0x90   :  { %1808 = vmatprep.subr.bf16.mxu1 %v2206_v12 }
  0x92   :  { %1785 = vmatpush3.bf16.msra.mxu0 %v2205_v10 }
  0x93   :  { %1809 = vmatpush3.bf16.msra.mxu1 %v2206_v12  ;;  %1786 = vmatprep.subr.bf16.mxu0 %v2207_v13 }
  0x94   :  { %1810 = vmatprep.subr.bf16.mxu1 %v2208_v14 }
  0x96   :  { %1787 = vmatpush3.bf16.msra.mxu0 %v2207_v13 }
  0x97   :  { %1811 = vmatpush3.bf16.msra.mxu1 %v2208_v14  ;;  %1788 = vmatprep.subr.bf16.mxu0 %v2209_v15 }
  0x98   :  { %1812 = vmatprep.subr.bf16.mxu1 %v2210_v16 }
  0x9a   :  { %1789 = vmatpush3.bf16.msra.mxu0 %v2209_v15 }
  0x9b   :  { %1813 = vmatpush3.bf16.msra.mxu1 %v2210_v16  ;;  %1822 = vmatprep.subr.bf16.mxu0 %v2474_v19 }
  0x9c   :  { %1842 = vmatprep.subr.bf16.mxu1 %v2474_v19 }
  0x9d   :  { %1791 = vmatmul.mubr.bf16.vlgmr.msra.gmra.mrb[0].mxu0 %v2212_v17 }
  0x9e   :  { %1815 = vmatmul.mubr.bf16.vlgmr.msra.gmra.mrb[0].mxu1 %v2212_v17  ;;  %1823 = vmatpush3.bf16.msra.mxu0 %v2659_v18 }
  0x9f   :  { %1843 = vmatpush3.bf16.msra.mxu1 %v2662_v20  ;;  %1824 = vmatprep.subr.bf16.mxu0 %v2474_v19 }
  0xa0   :  { %1844 = vmatprep.subr.bf16.mxu1 %v2474_v19  ;;  %1794 = vmatprep.mubr.bf16.mxu0 %v2223_v21 }
  0xa1   :  { %1818 = vmatprep.mubr.bf16.mxu1 %v2223_v21 }
  0xa2   :  { %1825 = vmatpush3.bf16.msra.mxu0 %v2665_v22 }
  0xa3   :  { %1845 = vmatpush3.bf16.msra.mxu1 %v2668_v23  ;;  %1826 = vmatprep.subr.bf16.mxu0 %v2474_v19 }
  0xa4   :  { %1846 = vmatprep.subr.bf16.mxu1 %v2474_v19 }
  0xa5   :  { %1795 = vmatmul.mubr.bf16.gmra.mrb[4].mxu0 %v2224_v24 }
  0xa6   :  { %1827 = vmatpush3.bf16.msra.mxu0 %v2673_v25  ;;  %1819 = vmatmul.mubr.bf16.gmra.mrb[4].mxu1 %v2224_v24 }
  0xa7   :  { %1847 = vmatpush3.bf16.msra.mxu1 %v2675_v26  ;;  %1828 = vmatprep.subr.bf16.mxu0 %v2474_v19 }
  0xa8   :  { %1848 = vmatprep.subr.bf16.mxu1 %v2474_v19  ;;  %1838 = vmatprep.mubr.msk.bf16.mxu0 %vm2475_vm0, %v2474_v19 }
  0xa9   :  { %1858 = vmatprep.mubr.msk.bf16.mxu1 %vm2475_vm0, %v2474_v19 }
  0xaa   :  { %1829 = vmatpush3.bf16.msra.mxu0 %v2681_v27 }
  0xab   :  { %1849 = vmatpush3.bf16.msra.mxu1 %v2683_v28  ;;  %1830 = vmatprep.subr.bf16.mxu0 %v2474_v19 }
  0xac   :  { %1850 = vmatprep.subr.bf16.mxu1 %v2474_v19 }
  0xae   :  { %1831 = vmatpush3.bf16.msra.mxu0 %v2694_v29 }
  0xaf   :  { %1851 = vmatpush3.bf16.msra.mxu1 %v2698_v30  ;;  %1832 = vmatprep.subr.bf16.mxu0 %v2474_v19 }
  0xb0   :  { %1852 = vmatprep.subr.bf16.mxu1 %v2474_v19 }
  0xb2   :  { %1833 = vmatpush3.bf16.msra.mxu0 %v2702_v31 }
  0xb3   :  { %1853 = vmatpush3.bf16.msra.mxu1 %v2706_v32  ;;  %1834 = vmatprep.subr.bf16.mxu0 %v2474_v19 }
  0xb4   :  { %1854 = vmatprep.subr.bf16.mxu1 %v2474_v19 }
  0xb6   :  { %1835 = vmatpush3.bf16.msra.mxu0 %v2710_v33 }
  0xb7   :  { %1855 = vmatpush3.bf16.msra.mxu1 %v2714_v34  ;;  %1836 = vmatprep.subr.bf16.mxu0 %v2474_v19 }
  0xb8   :  { %1856 = vmatprep.subr.bf16.mxu1 %v2474_v19 }
  0xba   :  { %1837 = vmatpush3.bf16.msra.mxu0 %v2718_v35 }
  0xbb   :  { %1857 = vmatpush3.bf16.msra.mxu1 %v2722_v36  ;;  %1862 = vmatprep.subr.bf16.mxu0 %v2474_v19 }
  0xbc   :  { %1882 = vmatprep.subr.bf16.mxu1 %v2474_v19 }
  0xbd   :  { %1839 = vmatmul.mubr.bf16.vlgmr.msra.gmra.mrb[8].mxu0 %v2476_v37 }
  0xbe   :  { %1859 = vmatmul.mubr.bf16.vlgmr.msra.gmra.mrb[8].mxu1 %v2476_v37  ;;  %1863 = vmatpush3.bf16.msra.mxu0 %v2659_v18 }
  0xbf   :  { %1883 = vmatpush3.bf16.msra.mxu1 %v2662_v20  ;;  %1864 = vmatprep.subr.bf16.mxu0 %v2474_v19 }
  0xc0   :  { %1884 = vmatprep.subr.bf16.mxu1 %v2474_v19  ;;  %1878 = vmatprep.mubr.msk.bf16.mxu0 %vm2475_vm0, %v2474_v19 }
  0xc1   :  { %1898 = vmatprep.mubr.msk.bf16.mxu1 %vm2475_vm0, %v2474_v19 }
  0xc2   :  { %1865 = vmatpush3.bf16.msra.mxu0 %v2665_v22 }
  0xc3   :  { %1885 = vmatpush3.bf16.msra.mxu1 %v2668_v23  ;;  %1866 = vmatprep.subr.bf16.mxu0 %v2474_v19 }
  0xc4   :  { %1886 = vmatprep.subr.bf16.mxu1 %v2474_v19 }
  0xc6   :  { %1867 = vmatpush3.bf16.msra.mxu0 %v2673_v25 }
  0xc7   :  { %1887 = vmatpush3.bf16.msra.mxu1 %v2675_v26  ;;  %1868 = vmatprep.subr.bf16.mxu0 %v2474_v19 }
  0xc8   :  { %1888 = vmatprep.subr.bf16.mxu1 %v2474_v19 }
  0xca   :  { %1869 = vmatpush3.bf16.msra.mxu0 %v2681_v27 }
  0xcb   :  { %1889 = vmatpush3.bf16.msra.mxu1 %v2683_v28  ;;  %1870 = vmatprep.subr.bf16.mxu0 %v2474_v19 }
  0xcc   :  { %1890 = vmatprep.subr.bf16.mxu1 %v2474_v19 }
  0xce   :  { %1871 = vmatpush3.bf16.msra.mxu0 %v2694_v29 }
  0xcf   :  { %1891 = vmatpush3.bf16.msra.mxu1 %v2698_v30  ;;  %1872 = vmatprep.subr.bf16.mxu0 %v2474_v19 }
  0xd0   :  { %1892 = vmatprep.subr.bf16.mxu1 %v2474_v19 }
  0xd2   :  { %1873 = vmatpush3.bf16.msra.mxu0 %v2702_v31 }
  0xd3   :  { %1893 = vmatpush3.bf16.msra.mxu1 %v2706_v32  ;;  %1874 = vmatprep.subr.bf16.mxu0 %v2474_v19 }
  0xd4   :  { %1894 = vmatprep.subr.bf16.mxu1 %v2474_v19 }
  0xd6   :  { %1875 = vmatpush3.bf16.msra.mxu0 %v2710_v33 }
  0xd7   :  { %1895 = vmatpush3.bf16.msra.mxu1 %v2714_v34  ;;  %1876 = vmatprep.subr.bf16.mxu0 %v2474_v19 }
  0xd8   :  { %1896 = vmatprep.subr.bf16.mxu1 %v2474_v19 }
  0xda   :  { %1877 = vmatpush3.bf16.msra.mxu0 %v2718_v35 }
  0xdb   :  { %1897 = vmatpush3.bf16.msra.mxu1 %v2722_v36  ;;  %1902 = vmatprep.subr.bf16.mxu0 %v2474_v19 }
  0xdc   :  { %1922 = vmatprep.subr.bf16.mxu1 %v2474_v19 }
 0x170   :  { %v1792_v40 = vpop.f32.mrb[0].mxu0 }
 0x171   :  { %v2771_v41 = vadd.f32 %v1792_v40, %v1533_v38  ;;  %v1816_v42 = vpop.f32.mrb[0].mxu1  ;;  %v285_v43 = vpop.f32.mrb[1].mxu0 }
 0x172   :  { %v2773_v44 = vadd.f32 %v1816_v42, %v1546_v39  ;;  %v413_v45 = vpop.f32.mrb[1].mxu1  ;;  %v1793_v46 = vpop.f32.mrb[2].mxu0  ;;  %v286_v6 = vadd.f32 %v1533_v38, %v285_v43 }
 0x173   :  { %v2775_v47 = vadd.f32 %v1546_v39, %v413_v45  ;;  %v2777_v48 = vadd.f32 %v1793_v46, %v1533_v38  ;;  %v1817_v49 = vpop.f32.mrb[2].mxu1  ;;  %v288_v50 = vpop.f32.mrb[3].mxu0 }
 0x174   :  { %v2779_v51 = vadd.f32 %v1817_v49, %v1546_v39  ;;  %v2781_v52 = vadd.f32 %v1533_v38, %v288_v50  ;;  %v416_v53 = vpop.f32.mrb[3].mxu1 }
 0x175   :  { %v2783_v54 = vadd.f32 %v1546_v39, %v416_v53 }
 0x178   :  { %v1796_v55 = vpop.f32.mrb[4].mxu0 }
 0x179   :  { %v2785_v56 = vadd.f32 %v1796_v55, %v1533_v38  ;;  %v1820_v57 = vpop.f32.mrb[4].mxu1  ;;  %v301_v58 = vpop.f32.mrb[5].mxu0 }
 0x17a   :  { %v2787_v59 = vadd.f32 %v1820_v57, %v1546_v39  ;;  %v2789_v60 = vadd.f32 %v1533_v38, %v301_v58  ;;  %v429_v61 = vpop.f32.mrb[5].mxu1  ;;  %v1797_v62 = vpop.f32.mrb[6].mxu0 }
 0x17b   :  { %v2791_v63 = vadd.f32 %v1546_v39, %v429_v61  ;;  %v2793_v0 = vadd.f32 %v1797_v62, %v1533_v38  ;;  %v1821_v1 = vpop.f32.mrb[6].mxu1  ;;  %v304_v2 = vpop.f32.mrb[7].mxu0 }
 0x17c   :  { %v2795_v3 = vadd.f32 %v1533_v38, %v304_v2  ;;  %v432_v4 = vpop.f32.mrb[7].mxu1  ;;  %v441_v7 = vadd.f32 %v1821_v1, %v1546_v39 }
 0x17d   :  { %v2797_v5 = vadd.f32 %v1546_v39, %v432_v4 }
 0x190   :  { %v567_v8 = vpop.f32.mrb[8].mxu0 }
 0x191   :  { %v573_v9 = vadd.f32 %v567_v8, %v286_v6  ;;  %v659_v10 = vpop.f32.mrb[8].mxu1  ;;  %v1840_v11 = vpop.f32.mrb[9].mxu0 }
 0x192   :  { %v665_v12 = vadd.f32 %v659_v10, %v441_v7  ;;  %v1860_v13 = vpop.f32.mrb[9].mxu1  ;;  %v570_v14 = vpop.f32.mrb[10].mxu0 }
 0x193   :  { %2247 = vtanh.f32 %v573_v9  ;;  %v662_v15 = vpop.f32.mrb[10].mxu1  ;;  %v1841_v16 = vpop.f32.mrb[11].mxu0 }
 0x194   :  { %2249 = vtanh.f32 %v665_v12  ;;  %v1861_v17 = vpop.f32.mrb[11].mxu1 }
 0x19d   :  { %v2248_v21 = vpop.eup %2247 }
 0x19e   :  { %v2250_v24 = vpop.eup %2249  ;;  %v669_v37 = vpack.c.bf16 %v2248_v21, %v2248_v21 }
 0x19f   :  { %v714_v40 = vpack.c.bf16 %v2250_v24, %v2250_v24 }
 0x1a0   :  { %1879 = vmatmul.mubr.bf16.vlgmr.msra.gmra.mrb[12].mxu0 %v669_v37 }
 0x1a1   :  { %1899 = vmatmul.mubr.bf16.vlgmr.msra.gmra.mrb[12].mxu1 %v714_v40  ;;  %1903 = vmatpush3.bf16.msra.mxu0 %v2659_v18 }
 0x1a2   :  { %1923 = vmatpush3.bf16.msra.mxu1 %v2662_v20  ;;  %1904 = vmatprep.subr.bf16.mxu0 %v2474_v19 }
 0x1a3   :  { %1924 = vmatprep.subr.bf16.mxu1 %v2474_v19  ;;  %1918 = vmatprep.mubr.msk.bf16.mxu0 %vm2475_vm0, %v2474_v19 }
 0x1a4   :  { %1938 = vmatprep.mubr.msk.bf16.mxu1 %vm2475_vm0, %v2474_v19 }
 0x1a5   :  { %1905 = vmatpush3.bf16.msra.mxu0 %v2665_v22 }
 0x1a6   :  { %1925 = vmatpush3.bf16.msra.mxu1 %v2668_v23  ;;  %1906 = vmatprep.subr.bf16.mxu0 %v2474_v19 }
 0x1a7   :  { %1926 = vmatprep.subr.bf16.mxu1 %v2474_v19 }
 0x1a9   :  { %1907 = vmatpush3.bf16.msra.mxu0 %v2673_v25 }
 0x1aa   :  { %1927 = vmatpush3.bf16.msra.mxu1 %v2675_v26  ;;  %1908 = vmatprep.subr.bf16.mxu0 %v2474_v19 }
 0x1ab   :  { %1928 = vmatprep.subr.bf16.mxu1 %v2474_v19 }
 0x1ad   :  { %1909 = vmatpush3.bf16.msra.mxu0 %v2681_v27 }
 0x1ae   :  { %1929 = vmatpush3.bf16.msra.mxu1 %v2683_v28  ;;  %1910 = vmatprep.subr.bf16.mxu0 %v2474_v19 }
 0x1af   :  { %1930 = vmatprep.subr.bf16.mxu1 %v2474_v19 }
 0x1b1   :  { %1911 = vmatpush3.bf16.msra.mxu0 %v2694_v29 }
 0x1b2   :  { %1931 = vmatpush3.bf16.msra.mxu1 %v2698_v30  ;;  %1912 = vmatprep.subr.bf16.mxu0 %v2474_v19 }
 0x1b3   :  { %1932 = vmatprep.subr.bf16.mxu1 %v2474_v19 }
 0x1b5   :  { %1913 = vmatpush3.bf16.msra.mxu0 %v2702_v31 }
 0x1b6   :  { %1933 = vmatpush3.bf16.msra.mxu1 %v2706_v32  ;;  %1914 = vmatprep.subr.bf16.mxu0 %v2474_v19 }
 0x1b7   :  { %1934 = vmatprep.subr.bf16.mxu1 %v2474_v19 }
 0x1b9   :  { %1915 = vmatpush3.bf16.msra.mxu0 %v2710_v33 }
 0x1ba   :  { %1935 = vmatpush3.bf16.msra.mxu1 %v2714_v34  ;;  %1916 = vmatprep.subr.bf16.mxu0 %v2474_v19 }
 0x1bb   :  { %1936 = vmatprep.subr.bf16.mxu1 %v2474_v19 }
 0x1bd   :  { %1917 = vmatpush3.bf16.msra.mxu0 %v2718_v35 }
 0x1be   :  { %1937 = vmatpush3.bf16.msra.mxu1 %v2722_v36  ;;  %1942 = vmatprep.subr.bf16.mxu0 %v2474_v19 }
 0x1bf   :  { %1962 = vmatprep.subr.bf16.mxu1 %v2474_v19 }
 0x273   :  { %v704_v38 = vpop.f32.mrb[12].mxu0 }
 0x274   :  { %v710_v39 = vadd.f32 %v704_v38, %v2781_v52  ;;  %v749_v42 = vpop.f32.mrb[12].mxu1  ;;  %v1880_v43 = vpop.f32.mrb[13].mxu0 }
 0x275   :  { %v755_v45 = vadd.f32 %v749_v42, %v2787_v59  ;;  %v1900_v46 = vpop.f32.mrb[13].mxu1  ;;  %v707_v49 = vpop.f32.mrb[14].mxu0 }
 0x276   :  { %2251 = vtanh.f32 %v710_v39  ;;  %v752_v50 = vpop.f32.mrb[14].mxu1  ;;  %v1881_v53 = vpop.f32.mrb[15].mxu0 }
 0x277   :  { %2253 = vtanh.f32 %v755_v45  ;;  %v1901_v55 = vpop.f32.mrb[15].mxu1 }
 0x280   :  { %v2252_v57 = vpop.eup %2251 }
 0x281   :  { %v2254_v58 = vpop.eup %2253  ;;  %v759_v61 = vpack.c.bf16 %v2252_v57, %v2252_v57 }
 0x282   :  { %v804_v62 = vpack.c.bf16 %v2254_v58, %v2254_v58 }
 0x283   :  { %1919 = vmatmul.mubr.bf16.vlgmr.msra.gmra.mrb[16].mxu0 %v759_v61 }
 0x284   :  { %1939 = vmatmul.mubr.bf16.vlgmr.msra.gmra.mrb[16].mxu1 %v804_v62  ;;  %1943 = vmatpush3.bf16.msra.mxu0 %v2659_v18 }
 0x285   :  { %1963 = vmatpush3.bf16.msra.mxu1 %v2662_v20  ;;  %1944 = vmatprep.subr.bf16.mxu0 %v2474_v19 }
 0x286   :  { %1964 = vmatprep.subr.bf16.mxu1 %v2474_v19  ;;  %1958 = vmatprep.mubr.msk.bf16.mxu0 %vm2475_vm0, %v2474_v19 }
 0x287   :  { %1978 = vmatprep.mubr.msk.bf16.mxu1 %vm2475_vm0, %v2474_v19 }
 0x288   :  { %1945 = vmatpush3.bf16.msra.mxu0 %v2665_v22 }
 0x289   :  { %1965 = vmatpush3.bf16.msra.mxu1 %v2668_v23  ;;  %1946 = vmatprep.subr.bf16.mxu0 %v2474_v19 }
 0x28a   :  { %1966 = vmatprep.subr.bf16.mxu1 %v2474_v19 }
 0x28c   :  { %1947 = vmatpush3.bf16.msra.mxu0 %v2673_v25 }
 0x28d   :  { %1967 = vmatpush3.bf16.msra.mxu1 %v2675_v26  ;;  %1948 = vmatprep.subr.bf16.mxu0 %v2474_v19 }
 0x28e   :  { %1968 = vmatprep.subr.bf16.mxu1 %v2474_v19 }
 0x290   :  { %1949 = vmatpush3.bf16.msra.mxu0 %v2681_v27 }
 0x291   :  { %1969 = vmatpush3.bf16.msra.mxu1 %v2683_v28  ;;  %1950 = vmatprep.subr.bf16.mxu0 %v2474_v19 }
 0x292   :  { %1970 = vmatprep.subr.bf16.mxu1 %v2474_v19 }
 0x294   :  { %1951 = vmatpush3.bf16.msra.mxu0 %v2694_v29 }
 0x295   :  { %1971 = vmatpush3.bf16.msra.mxu1 %v2698_v30  ;;  %1952 = vmatprep.subr.bf16.mxu0 %v2474_v19 }
 0x296   :  { %1972 = vmatprep.subr.bf16.mxu1 %v2474_v19 }
 0x298   :  { %1953 = vmatpush3.bf16.msra.mxu0 %v2702_v31 }
 0x299   :  { %1973 = vmatpush3.bf16.msra.mxu1 %v2706_v32  ;;  %1954 = vmatprep.subr.bf16.mxu0 %v2474_v19 }
 0x29a   :  { %1974 = vmatprep.subr.bf16.mxu1 %v2474_v19 }
 0x29c   :  { %1955 = vmatpush3.bf16.msra.mxu0 %v2710_v33 }
 0x29d   :  { %1975 = vmatpush3.bf16.msra.mxu1 %v2714_v34  ;;  %1956 = vmatprep.subr.bf16.mxu0 %v2474_v19 }
 0x29e   :  { %1976 = vmatprep.subr.bf16.mxu1 %v2474_v19 }
 0x2a0   :  { %1957 = vmatpush3.bf16.msra.mxu0 %v2718_v35 }
 0x2a1   :  { %1977 = vmatpush3.bf16.msra.mxu1 %v2722_v36  ;;  %1982 = vmatprep.subr.bf16.mxu0 %v2474_v19 }
 0x2a2   :  { %2002 = vmatprep.subr.bf16.mxu1 %v2474_v19 }
 0x356   :  { %v794_v52 = vpop.f32.mrb[16].mxu0 }
 0x357   :  { %v800_v59 = vadd.f32 %v794_v52, %v2771_v41  ;;  %v839_v1 = vpop.f32.mrb[16].mxu1  ;;  %v1920_v2 = vpop.f32.mrb[17].mxu0 }
 0x358   :  { %v845_v4 = vadd.f32 %v839_v1, %v2797_v5  ;;  %v1940_v6 = vpop.f32.mrb[17].mxu1  ;;  %v797_v7 = vpop.f32.mrb[18].mxu0 }
 0x359   :  { %2255 = vtanh.f32 %v800_v59  ;;  %v842_v8 = vpop.f32.mrb[18].mxu1  ;;  %v1921_v9 = vpop.f32.mrb[19].mxu0 }
 0x35a   :  { %2257 = vtanh.f32 %v845_v4  ;;  %v1941_v10 = vpop.f32.mrb[19].mxu1 }
 0x363   :  { %v2256_v11 = vpop.eup %2255 }
 0x364   :  { %v2258_v12 = vpop.eup %2257  ;;  %v849_v13 = vpack.c.bf16 %v2256_v11, %v2256_v11 }
 0x365   :  { %v894_v14 = vpack.c.bf16 %v2258_v12, %v2258_v12 }
 0x366   :  { %1959 = vmatmul.mubr.bf16.vlgmr.msra.gmra.mrb[20].mxu0 %v849_v13 }
 0x367   :  { %1979 = vmatmul.mubr.bf16.vlgmr.msra.gmra.mrb[20].mxu1 %v894_v14  ;;  %1983 = vmatpush3.bf16.msra.mxu0 %v2659_v18 }
 0x368   :  { %2003 = vmatpush3.bf16.msra.mxu1 %v2662_v20  ;;  %1984 = vmatprep.subr.bf16.mxu0 %v2474_v19 }
 0x369   :  { %2004 = vmatprep.subr.bf16.mxu1 %v2474_v19  ;;  %1998 = vmatprep.mubr.msk.bf16.mxu0 %vm2475_vm0, %v2474_v19 }
 0x36a   :  { %2018 = vmatprep.mubr.msk.bf16.mxu1 %vm2475_vm0, %v2474_v19 }
 0x36b   :  { %1985 = vmatpush3.bf16.msra.mxu0 %v2665_v22 }
 0x36c   :  { %2005 = vmatpush3.bf16.msra.mxu1 %v2668_v23  ;;  %1986 = vmatprep.subr.bf16.mxu0 %v2474_v19 }
 0x36d   :  { %2006 = vmatprep.subr.bf16.mxu1 %v2474_v19 }
 0x36f   :  { %1987 = vmatpush3.bf16.msra.mxu0 %v2673_v25 }
 0x370   :  { %2007 = vmatpush3.bf16.msra.mxu1 %v2675_v26  ;;  %1988 = vmatprep.subr.bf16.mxu0 %v2474_v19 }
 0x371   :  { %2008 = vmatprep.subr.bf16.mxu1 %v2474_v19 }
 0x373   :  { %1989 = vmatpush3.bf16.msra.mxu0 %v2681_v27 }
 0x374   :  { %2009 = vmatpush3.bf16.msra.mxu1 %v2683_v28  ;;  %1990 = vmatprep.subr.bf16.mxu0 %v2474_v19 }
 0x375   :  { %2010 = vmatprep.subr.bf16.mxu1 %v2474_v19 }
 0x377   :  { %1991 = vmatpush3.bf16.msra.mxu0 %v2694_v29 }
 0x378   :  { %2011 = vmatpush3.bf16.msra.mxu1 %v2698_v30  ;;  %1992 = vmatprep.subr.bf16.mxu0 %v2474_v19 }
 0x379   :  { %2012 = vmatprep.subr.bf16.mxu1 %v2474_v19 }
 0x37b   :  { %1993 = vmatpush3.bf16.msra.mxu0 %v2702_v31 }
 0x37c   :  { %2013 = vmatpush3.bf16.msra.mxu1 %v2706_v32  ;;  %1994 = vmatprep.subr.bf16.mxu0 %v2474_v19 }
 0x37d   :  { %2014 = vmatprep.subr.bf16.mxu1 %v2474_v19 }
 0x37f   :  { %1995 = vmatpush3.bf16.msra.mxu0 %v2710_v33 }
 0x380   :  { %2015 = vmatpush3.bf16.msra.mxu1 %v2714_v34  ;;  %1996 = vmatprep.subr.bf16.mxu0 %v2474_v19 }
 0x381   :  { %2016 = vmatprep.subr.bf16.mxu1 %v2474_v19 }
 0x383   :  { %1997 = vmatpush3.bf16.msra.mxu0 %v2718_v35 }
 0x384   :  { %2017 = vmatpush3.bf16.msra.mxu1 %v2722_v36  ;;  %2022 = vmatprep.subr.bf16.mxu0 %v2474_v19 }
 0x385   :  { %2042 = vmatprep.subr.bf16.mxu1 %v2474_v19 }
 0x439   :  { %v884_v41 = vpop.f32.mrb[20].mxu0 }
 0x43a   :  { %v890_v5 = vadd.f32 %v884_v41, %v2777_v48  ;;  %v929_v15 = vpop.f32.mrb[20].mxu1  ;;  %v1960_v16 = vpop.f32.mrb[21].mxu0 }
 0x43b   :  { %v935_v17 = vadd.f32 %v929_v15, %v2791_v63  ;;  %v1980_v21 = vpop.f32.mrb[21].mxu1  ;;  %v887_v24 = vpop.f32.mrb[22].mxu0  ;;  %v2238_v15 = vld [vmem:[#allocation13 + $0x18] sm:$0xff]   ;;  %v2239_v16 = vld [vmem:[#allocation15 + $0x20] sm:$0xff]  }
 0x43c   :  { %2259 = vtanh.f32 %v890_v5  ;;  %v932_v37 = vpop.f32.mrb[22].mxu1  ;;  %v1961_v40 = vpop.f32.mrb[23].mxu0  ;;  %v2237_v5 = vld [vmem:[#allocation15 + $0x18] sm:$0xff]   ;;  %v2241_v21 = vld [vmem:[#allocation15 + $0x28] sm:$0xff]  }
 0x43d   :  { %2261 = vtanh.f32 %v935_v17  ;;  %v1981_v38 = vpop.f32.mrb[23].mxu1  ;;  %v2240_v17 = vld [vmem:[#allocation13 + $0x20] sm:$0xff]   ;;  %v2242_v24 = vld [vmem:[#allocation13 + $0x28] sm:$0xff]   ;;  %v2243_v37 = vld [vmem:[#allocation15 + $0x30] sm:$0xff]  }
 0x43e   :  { %v2244_v40 = vld [vmem:[#allocation13 + $0x30] sm:$0xff]   ;;  %v2245_v38 = vld [vmem:[#allocation15 + $0x38] sm:$0xff]  }
 0x446   :  { %v2260_v39 = vpop.eup %2259 }
 0x447   :  { %v2262_v42 = vpop.eup %2261  ;;  %v939_v43 = vpack.c.bf16 %v2260_v39, %v2260_v39  ;;  %v2246_v39 = vld [vmem:[#allocation13 + $0x38] sm:$0xff]  }
 0x448   :  { %v984_v45 = vpack.c.bf16 %v2262_v42, %v2262_v42 }
 0x449   :  { %1999 = vmatmul.mubr.bf16.vlgmr.msra.gmra.mrb[24].mxu0 %v939_v43 }
 0x44a   :  { %2019 = vmatmul.mubr.bf16.vlgmr.msra.gmra.mrb[24].mxu1 %v984_v45  ;;  %2023 = vmatpush3.bf16.msra.mxu0 %v2659_v18 }
 0x44b   :  { %2043 = vmatpush3.bf16.msra.mxu1 %v2662_v20  ;;  %2024 = vmatprep.subr.bf16.mxu0 %v2474_v19 }
 0x44c   :  { %2044 = vmatprep.subr.bf16.mxu1 %v2474_v19  ;;  %2038 = vmatprep.mubr.msk.bf16.mxu0 %vm2475_vm0, %v2474_v19 }
 0x44d   :  { %2058 = vmatprep.mubr.msk.bf16.mxu1 %vm2475_vm0, %v2474_v19 }
 0x44e   :  { %2025 = vmatpush3.bf16.msra.mxu0 %v2665_v22 }
 0x44f   :  { %2045 = vmatpush3.bf16.msra.mxu1 %v2668_v23  ;;  %2026 = vmatprep.subr.bf16.mxu0 %v2474_v19 }
 0x450   :  { %2046 = vmatprep.subr.bf16.mxu1 %v2474_v19 }
 0x452   :  { %2027 = vmatpush3.bf16.msra.mxu0 %v2673_v25 }
 0x453   :  { %2047 = vmatpush3.bf16.msra.mxu1 %v2675_v26  ;;  %2028 = vmatprep.subr.bf16.mxu0 %v2474_v19 }
 0x454   :  { %2048 = vmatprep.subr.bf16.mxu1 %v2474_v19 }
 0x456   :  { %2029 = vmatpush3.bf16.msra.mxu0 %v2681_v27 }
 0x457   :  { %2049 = vmatpush3.bf16.msra.mxu1 %v2683_v28  ;;  %2030 = vmatprep.subr.bf16.mxu0 %v2474_v19 }
 0x458   :  { %2050 = vmatprep.subr.bf16.mxu1 %v2474_v19 }
 0x45a   :  { %2031 = vmatpush3.bf16.msra.mxu0 %v2694_v29 }
 0x45b   :  { %2051 = vmatpush3.bf16.msra.mxu1 %v2698_v30  ;;  %2032 = vmatprep.subr.bf16.mxu0 %v2474_v19 }
 0x45c   :  { %2052 = vmatprep.subr.bf16.mxu1 %v2474_v19 }
 0x45e   :  { %2033 = vmatpush3.bf16.msra.mxu0 %v2702_v31 }
 0x45f   :  { %2053 = vmatpush3.bf16.msra.mxu1 %v2706_v32  ;;  %2034 = vmatprep.subr.bf16.mxu0 %v2474_v19 }
 0x460   :  { %2054 = vmatprep.subr.bf16.mxu1 %v2474_v19 }
 0x462   :  { %2035 = vmatpush3.bf16.msra.mxu0 %v2710_v33 }
 0x463   :  { %2055 = vmatpush3.bf16.msra.mxu1 %v2714_v34  ;;  %2036 = vmatprep.subr.bf16.mxu0 %v2474_v19 }
 0x464   :  { %2056 = vmatprep.subr.bf16.mxu1 %v2474_v19 }
 0x466   :  { %2037 = vmatpush3.bf16.msra.mxu0 %v2718_v35 }
 0x467   :  { %2057 = vmatpush3.bf16.msra.mxu1 %v2722_v36  ;;  %2062 = vmatprep.subr.bf16.mxu0 %v2474_v19 }
 0x468   :  { %2082 = vmatprep.subr.bf16.mxu1 %v2474_v19 }
 0x51c   :  { %v974_v48 = vpop.f32.mrb[24].mxu0 }
 0x51d   :  { %v980_v63 = vadd.f32 %v974_v48, %v2789_v60  ;;  %v1019_v46 = vpop.f32.mrb[24].mxu1  ;;  %v2000_v49 = vpop.f32.mrb[25].mxu0 }
 0x51e   :  { %v1025_v50 = vadd.f32 %v1019_v46, %v2779_v51  ;;  %v2020_v53 = vpop.f32.mrb[25].mxu1  ;;  %v977_v55 = vpop.f32.mrb[26].mxu0 }
 0x51f   :  { %2263 = vtanh.f32 %v980_v63  ;;  %v1022_v57 = vpop.f32.mrb[26].mxu1  ;;  %v2001_v58 = vpop.f32.mrb[27].mxu0 }
 0x520   :  { %2265 = vtanh.f32 %v1025_v50  ;;  %v2021_v61 = vpop.f32.mrb[27].mxu1 }
 0x529   :  { %v2264_v62 = vpop.eup %2263 }
 0x52a   :  { %v2266_v52 = vpop.eup %2265  ;;  %v1029_v59 = vpack.c.bf16 %v2264_v62, %v2264_v62 }
 0x52b   :  { %v1074_v1 = vpack.c.bf16 %v2266_v52, %v2266_v52 }
 0x52c   :  { %2039 = vmatmul.mubr.bf16.vlgmr.msra.gmra.mrb[28].mxu0 %v1029_v59 }
 0x52d   :  { %2059 = vmatmul.mubr.bf16.vlgmr.msra.gmra.mrb[28].mxu1 %v1074_v1  ;;  %2063 = vmatpush3.bf16.msra.mxu0 %v2659_v18 }
 0x52e   :  { %2083 = vmatpush3.bf16.msra.mxu1 %v2662_v20  ;;  %2064 = vmatprep.subr.bf16.mxu0 %v2474_v19 }
 0x52f   :  { %2084 = vmatprep.subr.bf16.mxu1 %v2474_v19  ;;  %2078 = vmatprep.mubr.msk.bf16.mxu0 %vm2475_vm0, %v2474_v19 }
 0x530   :  { %2098 = vmatprep.mubr.msk.bf16.mxu1 %vm2475_vm0, %v2474_v19 }
 0x531   :  { %2065 = vmatpush3.bf16.msra.mxu0 %v2665_v22 }
 0x532   :  { %2085 = vmatpush3.bf16.msra.mxu1 %v2668_v23  ;;  %2066 = vmatprep.subr.bf16.mxu0 %v2474_v19 }
 0x533   :  { %2086 = vmatprep.subr.bf16.mxu1 %v2474_v19 }
 0x535   :  { %2067 = vmatpush3.bf16.msra.mxu0 %v2673_v25 }
 0x536   :  { %2087 = vmatpush3.bf16.msra.mxu1 %v2675_v26  ;;  %2068 = vmatprep.subr.bf16.mxu0 %v2474_v19 }
 0x537   :  { %2088 = vmatprep.subr.bf16.mxu1 %v2474_v19 }
 0x539   :  { %2069 = vmatpush3.bf16.msra.mxu0 %v2681_v27 }
 0x53a   :  { %2089 = vmatpush3.bf16.msra.mxu1 %v2683_v28  ;;  %2070 = vmatprep.subr.bf16.mxu0 %v2474_v19 }
 0x53b   :  { %2090 = vmatprep.subr.bf16.mxu1 %v2474_v19 }
 0x53d   :  { %2071 = vmatpush3.bf16.msra.mxu0 %v2694_v29 }
 0x53e   :  { %2091 = vmatpush3.bf16.msra.mxu1 %v2698_v30  ;;  %2072 = vmatprep.subr.bf16.mxu0 %v2474_v19 }
 0x53f   :  { %2092 = vmatprep.subr.bf16.mxu1 %v2474_v19 }
 0x541   :  { %2073 = vmatpush3.bf16.msra.mxu0 %v2702_v31 }
 0x542   :  { %2093 = vmatpush3.bf16.msra.mxu1 %v2706_v32  ;;  %2074 = vmatprep.subr.bf16.mxu0 %v2474_v19 }
 0x543   :  { %2094 = vmatprep.subr.bf16.mxu1 %v2474_v19 }
 0x545   :  { %2075 = vmatpush3.bf16.msra.mxu0 %v2710_v33 }
 0x546   :  { %2095 = vmatpush3.bf16.msra.mxu1 %v2714_v34  ;;  %2076 = vmatprep.subr.bf16.mxu0 %v2474_v19 }
 0x547   :  { %2096 = vmatprep.subr.bf16.mxu1 %v2474_v19 }
 0x549   :  { %2077 = vmatpush3.bf16.msra.mxu0 %v2718_v35 }
 0x54a   :  { %2097 = vmatpush3.bf16.msra.mxu1 %v2722_v36  ;;  %2102 = vmatprep.subr.bf16.mxu0 %v2474_v19 }
 0x54b   :  { %2122 = vmatprep.subr.bf16.mxu1 %v2474_v19 }
 0x5ff   :  { %v1064_v51 = vpop.f32.mrb[28].mxu0 }
 0x600   :  { %v1070_v60 = vadd.f32 %v1064_v51, %v2795_v3  ;;  %v1109_v2 = vpop.f32.mrb[28].mxu1  ;;  %v2040_v4 = vpop.f32.mrb[29].mxu0  ;;  %v2236_v3 = vld [vmem:[#allocation13 + $0x10] sm:$0xff]  }
 0x601   :  { %v1115_v6 = vadd.f32 %v1109_v2, %v2773_v44  ;;  %v2060_v7 = vpop.f32.mrb[29].mxu1  ;;  %v1067_v8 = vpop.f32.mrb[30].mxu0  ;;  %v2233_v44 = vld [vmem:[#allocation15 + $0x8] sm:$0xff]  }
 0x602   :  { %2267 = vtanh.f32 %v1070_v60  ;;  %v1112_v9 = vpop.f32.mrb[30].mxu1  ;;  %v2041_v10 = vpop.f32.mrb[31].mxu0 }
 0x603   :  { %2269 = vtanh.f32 %v1115_v6  ;;  %v2061_v11 = vpop.f32.mrb[31].mxu1 }
 0x60c   :  { %v2268_v12 = vpop.eup %2267 }
 0x60d   :  { %v2270_v13 = vpop.eup %2269  ;;  %v1119_v14 = vpack.c.bf16 %v2268_v12, %v2268_v12 }
 0x60e   :  { %v1164_v41 = vpack.c.bf16 %v2270_v13, %v2270_v13 }
 0x60f   :  { %2079 = vmatmul.mubr.bf16.vlgmr.msra.gmra.mrb[32].mxu0 %v1119_v14 }
 0x610   :  { %2099 = vmatmul.mubr.bf16.vlgmr.msra.gmra.mrb[32].mxu1 %v1164_v41  ;;  %2103 = vmatpush3.bf16.msra.mxu0 %v2659_v18 }
 0x611   :  { %2123 = vmatpush3.bf16.msra.mxu1 %v2662_v20  ;;  %2104 = vmatprep.subr.bf16.mxu0 %v2474_v19 }
 0x612   :  { %2124 = vmatprep.subr.bf16.mxu1 %v2474_v19  ;;  %2118 = vmatprep.mubr.msk.bf16.mxu0 %vm2475_vm0, %v2474_v19 }
 0x613   :  { %2138 = vmatprep.mubr.msk.bf16.mxu1 %vm2475_vm0, %v2474_v19 }
 0x614   :  { %2105 = vmatpush3.bf16.msra.mxu0 %v2665_v22 }
 0x615   :  { %2125 = vmatpush3.bf16.msra.mxu1 %v2668_v23  ;;  %2106 = vmatprep.subr.bf16.mxu0 %v2474_v19 }
 0x616   :  { %2126 = vmatprep.subr.bf16.mxu1 %v2474_v19 }
 0x618   :  { %2107 = vmatpush3.bf16.msra.mxu0 %v2673_v25 }
 0x619   :  { %2127 = vmatpush3.bf16.msra.mxu1 %v2675_v26  ;;  %2108 = vmatprep.subr.bf16.mxu0 %v2474_v19 }
 0x61a   :  { %2128 = vmatprep.subr.bf16.mxu1 %v2474_v19 }
 0x61c   :  { %2109 = vmatpush3.bf16.msra.mxu0 %v2681_v27 }
 0x61d   :  { %2129 = vmatpush3.bf16.msra.mxu1 %v2683_v28  ;;  %2110 = vmatprep.subr.bf16.mxu0 %v2474_v19 }
 0x61e   :  { %2130 = vmatprep.subr.bf16.mxu1 %v2474_v19 }
 0x620   :  { %2111 = vmatpush3.bf16.msra.mxu0 %v2694_v29 }
 0x621   :  { %2131 = vmatpush3.bf16.msra.mxu1 %v2698_v30  ;;  %2112 = vmatprep.subr.bf16.mxu0 %v2474_v19 }
 0x622   :  { %2132 = vmatprep.subr.bf16.mxu1 %v2474_v19 }
 0x624   :  { %2113 = vmatpush3.bf16.msra.mxu0 %v2702_v31 }
 0x625   :  { %2133 = vmatpush3.bf16.msra.mxu1 %v2706_v32  ;;  %2114 = vmatprep.subr.bf16.mxu0 %v2474_v19  ;;  %v2231_v32 = vld [vmem:[#allocation15] sm:$0xff]  }
 0x626   :  { %2134 = vmatprep.subr.bf16.mxu1 %v2474_v19 }
 0x628   :  { %2115 = vmatpush3.bf16.msra.mxu0 %v2710_v33 }
 0x629   :  { %2135 = vmatpush3.bf16.msra.mxu1 %v2714_v34  ;;  %2116 = vmatprep.subr.bf16.mxu0 %v2474_v19 }
 0x62a   :  { %2136 = vmatprep.subr.bf16.mxu1 %v2474_v19 }
 0x62c   :  { %2117 = vmatpush3.bf16.msra.mxu0 %v2718_v35  ;;  %v2232_v35 = vld [vmem:[#allocation13] sm:$0xff]  }
 0x62d   :  { %2137 = vmatpush3.bf16.msra.mxu1 %v2722_v36  ;;  %2142 = vmatprep.subr.bf16.mxu0 %v2474_v19 }
 0x62e   :  { %2162 = vmatprep.subr.bf16.mxu1 %v2474_v19 }
 0x6e2   :  { %v1154_v18 = vpop.f32.mrb[32].mxu0 }
 0x6e3   :  { %v1160_v20 = vadd.f32 %v1154_v18, %v2785_v56  ;;  %v1199_v22 = vpop.f32.mrb[32].mxu1  ;;  %v2080_v23 = vpop.f32.mrb[33].mxu0  ;;  %v2235_v56 = vld [vmem:[#allocation15 + $0x10] sm:$0xff]  }
 0x6e4   :  { %v1205_v25 = vadd.f32 %v1199_v22, %v2783_v54  ;;  %v2100_v26 = vpop.f32.mrb[33].mxu1  ;;  %v1157_v27 = vpop.f32.mrb[34].mxu0  ;;  %v2234_v54 = vld [vmem:[#allocation13 + $0x8] sm:$0xff]  }
 0x6e5   :  { %2271 = vtanh.f32 %v1160_v20  ;;  %v1202_v28 = vpop.f32.mrb[34].mxu1  ;;  %v2081_v29 = vpop.f32.mrb[35].mxu0 }
 0x6e6   :  { %2273 = vtanh.f32 %v1205_v25  ;;  %v2101_v30 = vpop.f32.mrb[35].mxu1 }
 0x6ef   :  { %v2272_v31 = vpop.eup %2271 }
 0x6f0   :  { %v2274_v33 = vpop.eup %2273  ;;  %v1209_v34 = vpack.c.bf16 %v2272_v31, %v2272_v31 }
 0x6f1   :  { %v1253_v36 = vpack.c.bf16 %v2274_v33, %v2274_v33 }
 0x6f2   :  { %2119 = vmatmul.mubr.bf16.vlgmr.msra.gmra.mrb[36].mxu0 %v1209_v34 }
 0x6f3   :  { %2139 = vmatmul.mubr.bf16.vlgmr.msra.gmra.mrb[36].mxu1 %v1253_v36  ;;  %2143 = vmatpush3.bf16.msra.mxu0 %v2231_v32 }
 0x6f4   :  { %2163 = vmatpush3.bf16.msra.mxu1 %v2232_v35  ;;  %2144 = vmatprep.subr.bf16.mxu0 %v2474_v19 }
 0x6f5   :  { %2164 = vmatprep.subr.bf16.mxu1 %v2474_v19  ;;  %2158 = vmatprep.mubr.msk.bf16.mxu0 %vm2475_vm0, %v2474_v19 }
 0x6f6   :  { %2178 = vmatprep.mubr.msk.bf16.mxu1 %vm2475_vm0, %v2474_v19 }
 0x6f7   :  { %2145 = vmatpush3.bf16.msra.mxu0 %v2233_v44 }
 0x6f8   :  { %2165 = vmatpush3.bf16.msra.mxu1 %v2234_v54  ;;  %2146 = vmatprep.subr.bf16.mxu0 %v2474_v19 }
 0x6f9   :  { %2166 = vmatprep.subr.bf16.mxu1 %v2474_v19 }
 0x6fb   :  { %2147 = vmatpush3.bf16.msra.mxu0 %v2235_v56 }
 0x6fc   :  { %2167 = vmatpush3.bf16.msra.mxu1 %v2236_v3  ;;  %2148 = vmatprep.subr.bf16.mxu0 %v2474_v19 }
 0x6fd   :  { %2168 = vmatprep.subr.bf16.mxu1 %v2474_v19 }
 0x6ff   :  { %2149 = vmatpush3.bf16.msra.mxu0 %v2237_v5 }
 0x700   :  { %2169 = vmatpush3.bf16.msra.mxu1 %v2238_v15  ;;  %2150 = vmatprep.subr.bf16.mxu0 %v2474_v19 }
 0x701   :  { %2170 = vmatprep.subr.bf16.mxu1 %v2474_v19 }
 0x703   :  { %2151 = vmatpush3.bf16.msra.mxu0 %v2239_v16 }
 0x704   :  { %2171 = vmatpush3.bf16.msra.mxu1 %v2240_v17  ;;  %2152 = vmatprep.subr.bf16.mxu0 %v2474_v19 }
 0x705   :  { %2172 = vmatprep.subr.bf16.mxu1 %v2474_v19 }
 0x707   :  { %2153 = vmatpush3.bf16.msra.mxu0 %v2241_v21 }
 0x708   :  { %2173 = vmatpush3.bf16.msra.mxu1 %v2242_v24  ;;  %2154 = vmatprep.subr.bf16.mxu0 %v2474_v19 }
 0x709   :  { %2174 = vmatprep.subr.bf16.mxu1 %v2474_v19 }
 0x70b   :  { %2155 = vmatpush3.bf16.msra.mxu0 %v2243_v37 }
 0x70c   :  { %2175 = vmatpush3.bf16.msra.mxu1 %v2244_v40  ;;  %2156 = vmatprep.subr.bf16.mxu0 %v2474_v19 }
 0x70d   :  { %2176 = vmatprep.subr.bf16.mxu1 %v2474_v19 }
 0x70f   :  { %2157 = vmatpush3.bf16.msra.mxu0 %v2245_v38 }
 0x710   :  { %2177 = vmatpush3.bf16.msra.mxu1 %v2246_v39 }
 0x7c5   :  { %v1244_v42 = vpop.f32.mrb[36].mxu0 }
 0x7c6   :  { %v1250_v43 = vadd.f32 %v1244_v42, %v2793_v0  ;;  %v1288_v45 = vpop.f32.mrb[36].mxu1  ;;  %v2120_v48 = vpop.f32.mrb[37].mxu0  ;;  %v1587_v0 = vld [vmem:[%s3071_s9] ss:$0 sm:$0xff] }
 0x7c7   :  { %v1294_v63 = vadd.f32 %v1288_v45, %v2775_v47  ;;  %v2140_v46 = vpop.f32.mrb[37].mxu1  ;;  %v1247_v49 = vpop.f32.mrb[38].mxu0 }
 0x7c8   :  { %2275 = vtanh.f32 %v1250_v43  ;;  %v1291_v50 = vpop.f32.mrb[38].mxu1  ;;  %v2121_v53 = vpop.f32.mrb[39].mxu0 }
 0x7c9   :  { %2277 = vtanh.f32 %v1294_v63  ;;  %v2141_v55 = vpop.f32.mrb[39].mxu1 }
 0x7d2   :  { %v2276_v57 = vpop.eup %2275 }
 0x7d3   :  { %v2278_v19 = vpop.eup %2277  ;;  %v1296_v58 = vpack.c.bf16 %v2276_v57, %v2276_v57 }
 0x7d4   :  { %v1313_v61 = vpack.c.bf16 %v2278_v19, %v2278_v19 }
 0x7d5   :  { %2179 = vmatmul.mubr.bf16.vlgmr.msra.gmra.mrb[40].mxu1 %v1296_v58 }
 0x7d6   :  { %2159 = vmatmul.mubr.bf16.vlgmr.msra.gmra.mrb[40].mxu0 %v1313_v61 }
 0x8a8   :  { %v1500_v62 = vpop.f32.mrb[40].mxu1 }
 0x8a9   :  { %v1412_v52 = vpop.f32.mrb[40].mxu0  ;;  %v2180_v47 = vpop.f32.mrb[41].mxu1 }
 0x8aa   :  { %v1501_v59 = vadd.f32 %v1500_v62, %v1412_v52  ;;  %v2160_v1 = vpop.f32.mrb[41].mxu0  ;;  %v1503_v51 = vpop.f32.mrb[42].mxu1 }
 0x8ab   :  { %v1415_v60 = vpop.f32.mrb[42].mxu0  ;;  %v2181_v2 = vpop.f32.mrb[43].mxu1 }
 0x8ac   :  { %v1513_v4 = vadd.f32 %v1587_v0, %v1501_v59  ;;  %v2161_v6 = vpop.f32.mrb[43].mxu0 }
 0x8ae   :  { %1514 = vst [vmem:[#allocation16] sm:$0xff] %v1513_v4 }
 0x8af   :  { %2444 = shalt.err (!%p2441_p4)
}
 0x8b0   :  { %s2445_s14 = scalar_lea.hbm %s3072_s10, 128 }
 0x8b1   :  { %p2446_p5 = scmp.ne.s32.totalorder %s3072_s10, %s2445_s14  ;;  %p2449_p6 = scmp.lt.u32.totalorder %s2445_s14, %s3072_s10 }
 0x8b3   :  { %p2451_p7 = pnand %p2449_p6, %p2446_p5 }
 0x8b5   :  { %2454 = shalt.err (!%p2451_p7)
}
 0x8b6   :  { %1524 = dma.vmem_to_hbm [thread:$0]  %s1522_s17, 128, %s3072_s10, [#allocation6]  }
 0x8b7   :  { %2463 = dma.done.wait [#allocation6], 128  }
 0x8b8   :  { %2464 = vsyncadd [#allocation6], 4294967168 }
 0x8b9   :  { %1528 = vsyncpa [#allocation5], 1 }
 0x8ba   :  { %1529 = vsyncpa [#allocation8], 1 }
 0x8bb   :  { %1530 = vsyncpa [#allocation11], 1 }
 0x8bc   :  { %1531 = vsyncpa [#allocation14], 1 }
 0x8bd   :  { %1532 = vsyncpa [#allocation6], 1 }

</bundles_post_ra>
